<compile_context>
chip_gen: v7x
topology: tpu7x:2x2x1
jax: 0.10.0
libtpu: 0.0.40
codegen_flags: <defaults>
</compile_context>

<pallas_src>
import functools

import numpy as np
import jax
import jax.numpy as jnp
from jax.experimental import pallas as pl
from jax.experimental.pallas import tpu as pltpu

# ----------------------------- configuration -------------------------------
STATE_SHAPE = (4, 16, 16)      # (C, H, W) -> 3D state => CNN path
ACTION_DIM = 6
CONV_LAYERS = ((8, 3),)        # (out_channels, kernel_size)
HIDDEN_DIMS = (32,)            # CNN feature dim == MLP output dim


# ------------------------------- kernel -------------------------------------
def _full_spec(shape):
    nd = len(shape)
    return pl.BlockSpec(shape, lambda i: (0,) * nd)


def _fused_kernel(x_ref, wc_ref, bc_ref, w1_ref, b1_ref, w2_ref, b2_ref,
                  wh_ref, bh_ref, q_ref, xpad_ref, stk_ref, gbuf_ref,
                  *, B, C, H, W, K, Cout):
    HW = H * W
    Hd = w2_ref.shape[0]

    # Zero-padded copy of the input so every conv tap is a plain static lane
    # slice.  The zero fill is required: the padded region feeds only the
    # "invalid" conv columns (later multiplied by zero weights), but it must
    # be finite (uninitialized VMEM could hold NaN and NaN*0 = NaN).
    xpad_ref[:, pl.ds(0, HW)] = x_ref[...]
    xpad_ref[:, pl.ds(HW, HW)] = jnp.zeros((B * C, HW), jnp.float32)

    # --- conv (VALID, stride 1) as one lane-dense matmul per batch element ---
    for b in range(B):
        # in-kernel im2col: stack the 9 shifted (C, HW) views -> (K*K*C, HW)
        for ky in range(K):
            for kx in range(K):
                k = ky * K + kx
                sh = ky * W + kx
                stk_ref[pl.ds(k * C, C), :] = \
                    xpad_ref[pl.ds(b * C, C), pl.ds(sh, HW)]
        conv = jnp.dot(wc_ref[...], stk_ref[...],
                       preferred_element_type=jnp.float32)     # (Cout, HW)
        gb = jnp.maximum(conv + bc_ref[...], 0.0)
        # store per (out-channel, batch) rows: row index = co * B + b
        for co in range(Cout):
            gbuf_ref[pl.ds(co * B + b, 1), :] = gb[co:co + 1, :]

    # --- dense layer 1: flatten folded into the padded/permuted weight ------
    acc = jnp.zeros((B, Hd), jnp.float32)
    for co in range(Cout):
        g_co = gbuf_ref[pl.ds(co * B, B), :].astype(jnp.bfloat16)   # (B, HW)
        w_co = w1_ref[pl.ds(co * HW, HW), :]                        # (HW, Hd) bf16
        acc = acc + jnp.dot(g_co, w_co, preferred_element_type=jnp.float32)
    h1 = jnp.maximum(acc + b1_ref[...], 0.0)

    # --- MLP layer -----------------------------------------------------------
    h2 = jnp.maximum(
        jnp.dot(h1, w2_ref[...], preferred_element_type=jnp.float32)
        + b2_ref[...], 0.0)

    # --- dueling head: single fused (value | advantage) matmul ---------------
    out = jnp.dot(h2, wh_ref[...], preferred_element_type=jnp.float32) + bh_ref[...]
    v = out[:, 0:1]
    a = out[:, 1:]
    q_ref[...] = v + a - jnp.mean(a, axis=1, keepdims=True)


# ------------------------------ parameters ----------------------------------
def init_params(key):
    C, H, W = STATE_SHAPE
    Cout, K = CONV_LAYERS[0]
    Ho, Wo = H - K + 1, W - K + 1
    flat = Cout * Ho * Wo
    Hd = HIDDEN_DIMS[-1]
    keys = jax.random.split(key, 10)

    def unif(k, shape, fan_in):
        bound = 1.0 / float(np.sqrt(fan_in))
        return jax.random.uniform(k, shape, jnp.float32, -bound, bound)

    return dict(
        conv_w=unif(keys[0], (Cout, C, K, K), C * K * K),   # OIHW (PyTorch)
        conv_b=unif(keys[1], (Cout,), C * K * K),
        fc_cnn_w=unif(keys[2], (Hd, flat), flat),           # Linear(flat, Hd)
        fc_cnn_b=unif(keys[3], (Hd,), flat),
        mlp_w=unif(keys[4], (Hd, Hd), Hd),                  # MLPNetwork(Hd, Hd, ())
        mlp_b=unif(keys[5], (Hd,), Hd),
        v_w=unif(keys[6], (1, Hd), Hd),                     # fc_value
        v_b=unif(keys[7], (1,), Hd),
        a_w=unif(keys[8], (ACTION_DIM, Hd), Hd),            # fc_advance
        a_b=unif(keys[9], (ACTION_DIM,), Hd),
    )


def prepare_kernel_params(params):
    """One-time repack of PyTorch-layout weights into kernel-ready layouts."""
    C, H, W = STATE_SHAPE
    Cout, K = CONV_LAYERS[0]
    Ho, Wo = H - K + 1, W - K + 1
    Hd = HIDDEN_DIMS[-1]

    # conv weight -> (Cout, K*K*C), column order (ky, kx, c) matching the
    # in-kernel im2col stacking order.
    wc = params["conv_w"].transpose(0, 2, 3, 1).reshape(Cout, K * K * C)
    bc = params["conv_b"].reshape(Cout, 1)

    # dense-1 weight: fold the PyTorch (C, H, W) flatten and the
    # valid(14x14) -> full(16x16) padding (zero rows) into the weight.
    w1 = params["fc_cnn_w"].reshape(Hd, Cout, Ho, Wo)
    w1 = jnp.pad(w1, ((0, 0), (0, 0), (0, H - Ho), (0, W - Wo)))
    w1 = w1.transpose(1, 2, 3, 0).reshape(Cout * H * W, Hd).astype(jnp.bfloat16)

    return dict(
        wc=wc.astype(jnp.float32),
        bc=bc.astype(jnp.float32),
        w1=w1,
        b1=params["fc_cnn_b"].reshape(1, Hd),
        w2=params["mlp_w"].T,
        b2=params["mlp_b"].reshape(1, Hd),
        wh=jnp.concatenate([params["v_w"].T, params["a_w"].T], axis=1),
        bh=jnp.concatenate([params["v_b"], params["a_b"]]).reshape(1, 1 + ACTION_DIM),
    )


# ------------------------------- forward ------------------------------------
def value_advance_forward(prep, s):
    C, H, W = STATE_SHAPE
    Cout, K = CONV_LAYERS[0]
    HW = H * W

    s = jnp.reshape(s, (-1, C, H, W)).astype(jnp.float32)
    B = s.shape[0]
    x = jnp.reshape(s, (B * C, HW))          # contiguous -> free reshape

    kernel = functools.partial(_fused_kernel, B=B, C=C, H=H, W=W, K=K, Cout=Cout)
    args = (x, prep["wc"], prep["bc"], prep["w1"], prep["b1"],
            prep["w2"], prep["b2"], prep["wh"], prep["bh"])

    return pl.pallas_call(
        kernel,
        out_shape=jax.ShapeDtypeStruct((B, ACTION_DIM), jnp.float32),
        grid=(1,),
        in_specs=[_full_spec(a.shape) for a in args],
        out_specs=_full_spec((B, ACTION_DIM)),
        scratch_shapes=[
            pltpu.VMEM((B * C, 2 * HW), jnp.float32),    # zero-padded input
            pltpu.VMEM((K * K * C, HW), jnp.float32),    # im2col stack (per batch)
            pltpu.VMEM((Cout * B, HW), jnp.float32),     # relu'd conv output
        ],
    )(*args)


# ------------------------------ reference -----------------------------------
def reference_forward(params, s):
    C, H, W = STATE_SHAPE
    s = jnp.reshape(s, (-1, C, H, W)).astype(jnp.float32)
    out = jax.lax.conv_general_dilated(
        s, params["conv_w"], (1, 1), "VALID",
        dimension_numbers=("NCHW", "OIHW", "NCHW"))
    out = jnp.maximum(out + params["conv_b"][None, :, None, None], 0.0)
    g = out.reshape(out.shape[0], -1)
    h1 = jnp.maximum(g @ params["fc_cnn_w"].T + params["fc_cnn_b"], 0.0)
    h2 = jnp.maximum(h1 @ params["mlp_w"].T + params["mlp_b"], 0.0)
    v = h2 @ params["v_w"].T + params["v_b"]
    a = h2 @ params["a_w"].T + params["a_b"]
    return v + a - a.mean(axis=1, keepdims=True)


# --------------------------------- main --------------------------------------
if __name__ == "__main__":
    key = jax.random.PRNGKey(0)
    k_param, k_x = jax.random.split(key)

    params = init_params(k_param)
    prep = prepare_kernel_params(params)          # one-time weight repack
    x = jax.random.normal(k_x, (2, *STATE_SHAPE), dtype=jnp.float32)  # (2, 4, 16, 16)

    q = value_advance_forward(prep, x)
    q = jax.block_until_ready(q)

    q_ref = reference_forward(params, x)
    # dense-1 weight is stored/consumed in bf16 -> relaxed tolerance (~1e-2)
    np.testing.assert_allclose(np.asarray(q), np.asarray(q_ref), rtol=1e-2, atol=1e-2)
    assert q.shape == (2, ACTION_DIM)

    print("KERNEL_OK")
</pallas_src>

<mosaic_0001>
module attributes {stable_mosaic.version = 11 : i64} {
  func.func @_fused_kernel(%arg0: i32, %arg1: memref<8x256xf32, #tpu.memory_space<vmem>>, %arg2: memref<8x36xf32, #tpu.memory_space<vmem>>, %arg3: memref<8x1xf32, #tpu.memory_space<vmem>>, %arg4: memref<2048x32xbf16, #tpu.memory_space<vmem>>, %arg5: memref<1x32xf32, #tpu.memory_space<vmem>>, %arg6: memref<32x32xf32, #tpu.memory_space<vmem>>, %arg7: memref<1x32xf32, #tpu.memory_space<vmem>>, %arg8: memref<32x7xf32, #tpu.memory_space<vmem>>, %arg9: memref<1x7xf32, #tpu.memory_space<vmem>>, %arg10: memref<2x6xf32, #tpu.memory_space<vmem>>, %arg11: memref<8x512xf32, #tpu.memory_space<vmem>>, %arg12: memref<36x256xf32, #tpu.memory_space<vmem>>, %arg13: memref<16x256xf32, #tpu.memory_space<vmem>>) attributes {dimension_semantics = [#tpu.dimension_semantics<arbitrary>], iteration_bounds = array<i64: 1>, scalar_prefetch = 0 : i64, scratch_operands = 3 : i64, tpu.core_type = #tpu.core_type<tc>, window_params = [{pipeline_mode = #tpu.pipeline_mode<synchronous>, transform_indices = @transform_0, window_bounds = array<i64: 8, 256>}, {pipeline_mode = #tpu.pipeline_mode<synchronous>, transform_indices = @transform_1, window_bounds = array<i64: 8, 36>}, {pipeline_mode = #tpu.pipeline_mode<synchronous>, transform_indices = @transform_2, window_bounds = array<i64: 8, 1>}, {pipeline_mode = #tpu.pipeline_mode<synchronous>, transform_indices = @transform_3, window_bounds = array<i64: 2048, 32>}, {pipeline_mode = #tpu.pipeline_mode<synchronous>, transform_indices = @transform_4, window_bounds = array<i64: 1, 32>}, {pipeline_mode = #tpu.pipeline_mode<synchronous>, transform_indices = @transform_5, window_bounds = array<i64: 32, 32>}, {pipeline_mode = #tpu.pipeline_mode<synchronous>, transform_indices = @transform_6, window_bounds = array<i64: 1, 32>}, {pipeline_mode = #tpu.pipeline_mode<synchronous>, transform_indices = @transform_7, window_bounds = array<i64: 32, 7>}, {pipeline_mode = #tpu.pipeline_mode<synchronous>, transform_indices = @transform_8, window_bounds = array<i64: 1, 7>}, {pipeline_mode = #tpu.pipeline_mode<synchronous>, transform_indices = @transform_9, window_bounds = array<i64: 2, 6>}]} {
    %c0 = arith.constant 0 : index
    %c0_0 = arith.constant 0 : index
    %0 = vector.load %arg1[%c0, %c0_0] : memref<8x256xf32, #tpu.memory_space<vmem>>, vector<8x256xf32>
    %c0_1 = arith.constant 0 : index
    %c0_2 = arith.constant 0 : index
    %1 = vector.load %arg11[%c0_1, %c0_2] : memref<8x512xf32, #tpu.memory_space<vmem>>, vector<8x256xf32>
    tpu.vector_store %arg11[%c0_1, %c0_2], %0 {strides = array<i32>} : memref<8x512xf32, #tpu.memory_space<vmem>>, vector<8x256xf32>,
    %cst = arith.constant 0.000000e+00 : f32
    %2 = vector.broadcast %cst : f32 to vector<8x256xf32>
    %c0_3 = arith.constant 0 : index
    %c256 = arith.constant 256 : index
    %3 = vector.load %arg11[%c0_3, %c256] : memref<8x512xf32, #tpu.memory_space<vmem>>, vector<8x256xf32>
    tpu.vector_store %arg11[%c0_3, %c256], %2 {strides = array<i32>} : memref<8x512xf32, #tpu.memory_space<vmem>>, vector<8x256xf32>,
    %c0_4 = arith.constant 0 : index
    %c0_5 = arith.constant 0 : index
    %4 = vector.load %arg11[%c0_4, %c0_5] : memref<8x512xf32, #tpu.memory_space<vmem>>, vector<4x256xf32>
    %c0_6 = arith.constant 0 : index
    %c0_7 = arith.constant 0 : index
    %5 = vector.load %arg12[%c0_6, %c0_7] : memref<36x256xf32, #tpu.memory_space<vmem>>, vector<4x256xf32>
    tpu.vector_store %arg12[%c0_6, %c0_7], %4 {strides = array<i32>} : memref<36x256xf32, #tpu.memory_space<vmem>>, vector<4x256xf32>,
    %c0_8 = arith.constant 0 : index
    %c1 = arith.constant 1 : index
    %6 = vector.load %arg11[%c0_8, %c1] : memref<8x512xf32, #tpu.memory_space<vmem>>, vector<4x256xf32>
    %c4 = arith.constant 4 : index
    %c0_9 = arith.constant 0 : index
    %7 = vector.load %arg12[%c4, %c0_9] : memref<36x256xf32, #tpu.memory_space<vmem>>, vector<4x256xf32>
    tpu.vector_store %arg12[%c4, %c0_9], %6 {strides = array<i32>} : memref<36x256xf32, #tpu.memory_space<vmem>>, vector<4x256xf32>,
    %c0_10 = arith.constant 0 : index
    %c2 = arith.constant 2 : index
    %8 = vector.load %arg11[%c0_10, %c2] : memref<8x512xf32, #tpu.memory_space<vmem>>, vector<4x256xf32>
    %c8 = arith.constant 8 : index
    %c0_11 = arith.constant 0 : index
    %9 = vector.load %arg12[%c8, %c0_11] : memref<36x256xf32, #tpu.memory_space<vmem>>, vector<4x256xf32>
    tpu.vector_store %arg12[%c8, %c0_11], %8 {strides = array<i32>} : memref<36x256xf32, #tpu.memory_space<vmem>>, vector<4x256xf32>,
    %c0_12 = arith.constant 0 : index
    %c16 = arith.constant 16 : index
    %10 = vector.load %arg11[%c0_12, %c16] : memref<8x512xf32, #tpu.memory_space<vmem>>, vector<4x256xf32>
    %c12 = arith.constant 12 : index
    %c0_13 = arith.constant 0 : index
    %11 = vector.load %arg12[%c12, %c0_13] : memref<36x256xf32, #tpu.memory_space<vmem>>, vector<4x256xf32>
    tpu.vector_store %arg12[%c12, %c0_13], %10 {strides = array<i32>} : memref<36x256xf32, #tpu.memory_space<vmem>>, vector<4x256xf32>,
    %c0_14 = arith.constant 0 : index
    %c17 = arith.constant 17 : index
    %12 = vector.load %arg11[%c0_14, %c17] : memref<8x512xf32, #tpu.memory_space<vmem>>, vector<4x256xf32>
    %c16_15 = arith.constant 16 : index
    %c0_16 = arith.constant 0 : index
    %13 = vector.load %arg12[%c16_15, %c0_16] : memref<36x256xf32, #tpu.memory_space<vmem>>, vector<4x256xf32>
    tpu.vector_store %arg12[%c16_15, %c0_16], %12 {strides = array<i32>} : memref<36x256xf32, #tpu.memory_space<vmem>>, vector<4x256xf32>,
    %c0_17 = arith.constant 0 : index
    %c18 = arith.constant 18 : index
    %14 = vector.load %arg11[%c0_17, %c18] : memref<8x512xf32, #tpu.memory_space<vmem>>, vector<4x256xf32>
    %c20 = arith.constant 20 : index
    %c0_18 = arith.constant 0 : index
    %15 = vector.load %arg12[%c20, %c0_18] : memref<36x256xf32, #tpu.memory_space<vmem>>, vector<4x256xf32>
    tpu.vector_store %arg12[%c20, %c0_18], %14 {strides = array<i32>} : memref<36x256xf32, #tpu.memory_space<vmem>>, vector<4x256xf32>,
    %c0_19 = arith.constant 0 : index
    %c32 = arith.constant 32 : index
    %16 = vector.load %arg11[%c0_19, %c32] : memref<8x512xf32, #tpu.memory_space<vmem>>, vector<4x256xf32>
    %c24 = arith.constant 24 : index
    %c0_20 = arith.constant 0 : index
    %17 = vector.load %arg12[%c24, %c0_20] : memref<36x256xf32, #tpu.memory_space<vmem>>, vector<4x256xf32>
    tpu.vector_store %arg12[%c24, %c0_20], %16 {strides = array<i32>} : memref<36x256xf32, #tpu.memory_space<vmem>>, vector<4x256xf32>,
    %c0_21 = arith.constant 0 : index
    %c33 = arith.constant 33 : index
    %18 = vector.load %arg11[%c0_21, %c33] : memref<8x512xf32, #tpu.memory_space<vmem>>, vector<4x256xf32>
    %c28 = arith.constant 28 : index
    %c0_22 = arith.constant 0 : index
    %19 = vector.load %arg12[%c28, %c0_22] : memref<36x256xf32, #tpu.memory_space<vmem>>, vector<4x256xf32>
    tpu.vector_store %arg12[%c28, %c0_22], %18 {strides = array<i32>} : memref<36x256xf32, #tpu.memory_space<vmem>>, vector<4x256xf32>,
    %c0_23 = arith.constant 0 : index
    %c34 = arith.constant 34 : index
    %20 = vector.load %arg11[%c0_23, %c34] : memref<8x512xf32, #tpu.memory_space<vmem>>, vector<4x256xf32>
    %c32_24 = arith.constant 32 : index
    %c0_25 = arith.constant 0 : index
    %21 = vector.load %arg12[%c32_24, %c0_25] : memref<36x256xf32, #tpu.memory_space<vmem>>, vector<4x256xf32>
    tpu.vector_store %arg12[%c32_24, %c0_25], %20 {strides = array<i32>} : memref<36x256xf32, #tpu.memory_space<vmem>>, vector<4x256xf32>,
    %c0_26 = arith.constant 0 : index
    %c0_27 = arith.constant 0 : index
    %22 = vector.load %arg2[%c0_26, %c0_27] : memref<8x36xf32, #tpu.memory_space<vmem>>, vector<8x36xf32>
    %c0_28 = arith.constant 0 : index
    %c0_29 = arith.constant 0 : index
    %23 = vector.load %arg12[%c0_28, %c0_29] : memref<36x256xf32, #tpu.memory_space<vmem>>, vector<36x256xf32>
    %cst_30 = arith.constant dense<0.000000e+00> : vector<8x256xf32>
    %24 = tpu.matmul %22, %23, %cst_30 {dimension_numbers = #tpu.dot_dimension_numbers<[1], [0], [0], [1], [0, 0, 1, 1], [], []>} : vector<8x36xf32>, vector<36x256xf32>, vector<8x256xf32> -> vector<8x256xf32>
    %c0_31 = arith.constant 0 : index
    %c0_32 = arith.constant 0 : index
    %25 = vector.load %arg3[%c0_31, %c0_32] : memref<8x1xf32, #tpu.memory_space<vmem>>, vector<8x1xf32>
    %26 = vector.broadcast %25 : vector<8x1xf32> to vector<8x256xf32>
    %27 = arith.addf %24, %26 : vector<8x256xf32>
    %cst_33 = arith.constant 0.000000e+00 : f32
    %28 = vector.broadcast %cst_33 : f32 to vector<8x256xf32>
    %29 = arith.maximumf %27, %28 : vector<8x256xf32>
    %30 = vector.extract_strided_slice %29 {offsets = [0, 0], sizes = [1, 256], strides = [1, 1]} : vector<8x256xf32> to vector<1x256xf32>
    %c0_34 = arith.constant 0 : index
    %c0_35 = arith.constant 0 : index
    %31 = vector.load %arg13[%c0_34, %c0_35] : memref<16x256xf32, #tpu.memory_space<vmem>>, vector<1x256xf32>
    tpu.vector_store %arg13[%c0_34, %c0_35], %30 {strides = array<i32>} : memref<16x256xf32, #tpu.memory_space<vmem>>, vector<1x256xf32>,
    %32 = vector.extract_strided_slice %29 {offsets = [1, 0], sizes = [1, 256], strides = [1, 1]} : vector<8x256xf32> to vector<1x256xf32>
    %c2_36 = arith.constant 2 : index
    %c0_37 = arith.constant 0 : index
    %33 = vector.load %arg13[%c2_36, %c0_37] : memref<16x256xf32, #tpu.memory_space<vmem>>, vector<1x256xf32>
    tpu.vector_store %arg13[%c2_36, %c0_37], %32 {strides = array<i32>} : memref<16x256xf32, #tpu.memory_space<vmem>>, vector<1x256xf32>,
    %34 = vector.extract_strided_slice %29 {offsets = [2, 0], sizes = [1, 256], strides = [1, 1]} : vector<8x256xf32> to vector<1x256xf32>
    %c4_38 = arith.constant 4 : index
    %c0_39 = arith.constant 0 : index
    %35 = vector.load %arg13[%c4_38, %c0_39] : memref<16x256xf32, #tpu.memory_space<vmem>>, vector<1x256xf32>
    tpu.vector_store %arg13[%c4_38, %c0_39], %34 {strides = array<i32>} : memref<16x256xf32, #tpu.memory_space<vmem>>, vector<1x256xf32>,
    %36 = vector.extract_strided_slice %29 {offsets = [3, 0], sizes = [1, 256], strides = [1, 1]} : vector<8x256xf32> to vector<1x256xf32>
    %c6 = arith.constant 6 : index
    %c0_40 = arith.constant 0 : index
    %37 = vector.load %arg13[%c6, %c0_40] : memref<16x256xf32, #tpu.memory_space<vmem>>, vector<1x256xf32>
    tpu.vector_store %arg13[%c6, %c0_40], %36 {strides = array<i32>} : memref<16x256xf32, #tpu.memory_space<vmem>>, vector<1x256xf32>,
    %38 = vector.extract_strided_slice %29 {offsets = [4, 0], sizes = [1, 256], strides = [1, 1]} : vector<8x256xf32> to vector<1x256xf32>
    %c8_41 = arith.constant 8 : index
    %c0_42 = arith.constant 0 : index
    %39 = vector.load %arg13[%c8_41, %c0_42] : memref<16x256xf32, #tpu.memory_space<vmem>>, vector<1x256xf32>
    tpu.vector_store %arg13[%c8_41, %c0_42], %38 {strides = array<i32>} : memref<16x256xf32, #tpu.memory_space<vmem>>, vector<1x256xf32>,
    %40 = vector.extract_strided_slice %29 {offsets = [5, 0], sizes = [1, 256], strides = [1, 1]} : vector<8x256xf32> to vector<1x256xf32>
    %c10 = arith.constant 10 : index
    %c0_43 = arith.constant 0 : index
    %41 = vector.load %arg13[%c10, %c0_43] : memref<16x256xf32, #tpu.memory_space<vmem>>, vector<1x256xf32>
    tpu.vector_store %arg13[%c10, %c0_43], %40 {strides = array<i32>} : memref<16x256xf32, #tpu.memory_space<vmem>>, vector<1x256xf32>,
    %42 = vector.extract_strided_slice %29 {offsets = [6, 0], sizes = [1, 256], strides = [1, 1]} : vector<8x256xf32> to vector<1x256xf32>
    %c12_44 = arith.constant 12 : index
    %c0_45 = arith.constant 0 : index
    %43 = vector.load %arg13[%c12_44, %c0_45] : memref<16x256xf32, #tpu.memory_space<vmem>>, vector<1x256xf32>
    tpu.vector_store %arg13[%c12_44, %c0_45], %42 {strides = array<i32>} : memref<16x256xf32, #tpu.memory_space<vmem>>, vector<1x256xf32>,
    %44 = vector.extract_strided_slice %29 {offsets = [7, 0], sizes = [1, 256], strides = [1, 1]} : vector<8x256xf32> to vector<1x256xf32>
    %c14 = arith.constant 14 : index
    %c0_46 = arith.constant 0 : index
    %45 = vector.load %arg13[%c14, %c0_46] : memref<16x256xf32, #tpu.memory_space<vmem>>, vector<1x256xf32>
    tpu.vector_store %arg13[%c14, %c0_46], %44 {strides = array<i32>} : memref<16x256xf32, #tpu.memory_space<vmem>>, vector<1x256xf32>,
    %c4_47 = arith.constant 4 : index
    %c0_48 = arith.constant 0 : index
    %46 = vector.load %arg11[%c4_47, %c0_48] : memref<8x512xf32, #tpu.memory_space<vmem>>, vector<4x256xf32>
    %c0_49 = arith.constant 0 : index
    %c0_50 = arith.constant 0 : index
    %47 = vector.load %arg12[%c0_49, %c0_50] : memref<36x256xf32, #tpu.memory_space<vmem>>, vector<4x256xf32>
    tpu.vector_store %arg12[%c0_49, %c0_50], %46 {strides = array<i32>} : memref<36x256xf32, #tpu.memory_space<vmem>>, vector<4x256xf32>,
    %c4_51 = arith.constant 4 : index
    %c1_52 = arith.constant 1 : index
    %48 = vector.load %arg11[%c4_51, %c1_52] : memref<8x512xf32, #tpu.memory_space<vmem>>, vector<4x256xf32>
    %c4_53 = arith.constant 4 : index
    %c0_54 = arith.constant 0 : index
    %49 = vector.load %arg12[%c4_53, %c0_54] : memref<36x256xf32, #tpu.memory_space<vmem>>, vector<4x256xf32>
    tpu.vector_store %arg12[%c4_53, %c0_54], %48 {strides = array<i32>} : memref<36x256xf32, #tpu.memory_space<vmem>>, vector<4x256xf32>,
    %c4_55 = arith.constant 4 : index
    %c2_56 = arith.constant 2 : index
    %50 = vector.load %arg11[%c4_55, %c2_56] : memref<8x512xf32, #tpu.memory_space<vmem>>, vector<4x256xf32>
    %c8_57 = arith.constant 8 : index
    %c0_58 = arith.constant 0 : index
    %51 = vector.load %arg12[%c8_57, %c0_58] : memref<36x256xf32, #tpu.memory_space<vmem>>, vector<4x256xf32>
    tpu.vector_store %arg12[%c8_57, %c0_58], %50 {strides = array<i32>} : memref<36x256xf32, #tpu.memory_space<vmem>>, vector<4x256xf32>,
    %c4_59 = arith.constant 4 : index
    %c16_60 = arith.constant 16 : index
    %52 = vector.load %arg11[%c4_59, %c16_60] : memref<8x512xf32, #tpu.memory_space<vmem>>, vector<4x256xf32>
    %c12_61 = arith.constant 12 : index
    %c0_62 = arith.constant 0 : index
    %53 = vector.load %arg12[%c12_61, %c0_62] : memref<36x256xf32, #tpu.memory_space<vmem>>, vector<4x256xf32>
    tpu.vector_store %arg12[%c12_61, %c0_62], %52 {strides = array<i32>} : memref<36x256xf32, #tpu.memory_space<vmem>>, vector<4x256xf32>,
    %c4_63 = arith.constant 4 : index
    %c17_64 = arith.constant 17 : index
    %54 = vector.load %arg11[%c4_63, %c17_64] : memref<8x512xf32, #tpu.memory_space<vmem>>, vector<4x256xf32>
    %c16_65 = arith.constant 16 : index
    %c0_66 = arith.constant 0 : index
    %55 = vector.load %arg12[%c16_65, %c0_66] : memref<36x256xf32, #tpu.memory_space<vmem>>, vector<4x256xf32>
    tpu.vector_store %arg12[%c16_65, %c0_66], %54 {strides = array<i32>} : memref<36x256xf32, #tpu.memory_space<vmem>>, vector<4x256xf32>,
    %c4_67 = arith.constant 4 : index
    %c18_68 = arith.constant 18 : index
    %56 = vector.load %arg11[%c4_67, %c18_68] : memref<8x512xf32, #tpu.memory_space<vmem>>, vector<4x256xf32>
    %c20_69 = arith.constant 20 : index
    %c0_70 = arith.constant 0 : index
    %57 = vector.load %arg12[%c20_69, %c0_70] : memref<36x256xf32, #tpu.memory_space<vmem>>, vector<4x256xf32>
    tpu.vector_store %arg12[%c20_69, %c0_70], %56 {strides = array<i32>} : memref<36x256xf32, #tpu.memory_space<vmem>>, vector<4x256xf32>,
    %c4_71 = arith.constant 4 : index
    %c32_72 = arith.constant 32 : index
    %58 = vector.load %arg11[%c4_71, %c32_72] : memref<8x512xf32, #tpu.memory_space<vmem>>, vector<4x256xf32>
    %c24_73 = arith.constant 24 : index
    %c0_74 = arith.constant 0 : index
    %59 = vector.load %arg12[%c24_73, %c0_74] : memref<36x256xf32, #tpu.memory_space<vmem>>, vector<4x256xf32>
    tpu.vector_store %arg12[%c24_73, %c0_74], %58 {strides = array<i32>} : memref<36x256xf32, #tpu.memory_space<vmem>>, vector<4x256xf32>,
    %c4_75 = arith.constant 4 : index
    %c33_76 = arith.constant 33 : index
    %60 = vector.load %arg11[%c4_75, %c33_76] : memref<8x512xf32, #tpu.memory_space<vmem>>, vector<4x256xf32>
    %c28_77 = arith.constant 28 : index
    %c0_78 = arith.constant 0 : index
    %61 = vector.load %arg12[%c28_77, %c0_78] : memref<36x256xf32, #tpu.memory_space<vmem>>, vector<4x256xf32>
    tpu.vector_store %arg12[%c28_77, %c0_78], %60 {strides = array<i32>} : memref<36x256xf32, #tpu.memory_space<vmem>>, vector<4x256xf32>,
    %c4_79 = arith.constant 4 : index
    %c34_80 = arith.constant 34 : index
    %62 = vector.load %arg11[%c4_79, %c34_80] : memref<8x512xf32, #tpu.memory_space<vmem>>, vector<4x256xf32>
    %c32_81 = arith.constant 32 : index
    %c0_82 = arith.constant 0 : index
    %63 = vector.load %arg12[%c32_81, %c0_82] : memref<36x256xf32, #tpu.memory_space<vmem>>, vector<4x256xf32>
    tpu.vector_store %arg12[%c32_81, %c0_82], %62 {strides = array<i32>} : memref<36x256xf32, #tpu.memory_space<vmem>>, vector<4x256xf32>,
    %c0_83 = arith.constant 0 : index
    %c0_84 = arith.constant 0 : index
    %64 = vector.load %arg2[%c0_83, %c0_84] : memref<8x36xf32, #tpu.memory_space<vmem>>, vector<8x36xf32>
    %c0_85 = arith.constant 0 : index
    %c0_86 = arith.constant 0 : index
    %65 = vector.load %arg12[%c0_85, %c0_86] : memref<36x256xf32, #tpu.memory_space<vmem>>, vector<36x256xf32>
    %cst_87 = arith.constant dense<0.000000e+00> : vector<8x256xf32>
    %66 = tpu.matmul %64, %65, %cst_87 {dimension_numbers = #tpu.dot_dimension_numbers<[1], [0], [0], [1], [0, 0, 1, 1], [], []>} : vector<8x36xf32>, vector<36x256xf32>, vector<8x256xf32> -> vector<8x256xf32>
    %c0_88 = arith.constant 0 : index
    %c0_89 = arith.constant 0 : index
    %67 = vector.load %arg3[%c0_88, %c0_89] : memref<8x1xf32, #tpu.memory_space<vmem>>, vector<8x1xf32>
    %68 = vector.broadcast %67 : vector<8x1xf32> to vector<8x256xf32>
    %69 = arith.addf %66, %68 : vector<8x256xf32>
    %cst_90 = arith.constant 0.000000e+00 : f32
    %70 = vector.broadcast %cst_90 : f32 to vector<8x256xf32>
    %71 = arith.maximumf %69, %70 : vector<8x256xf32>
    %72 = vector.extract_strided_slice %71 {offsets = [0, 0], sizes = [1, 256], strides = [1, 1]} : vector<8x256xf32> to vector<1x256xf32>
    %c1_91 = arith.constant 1 : index
    %c0_92 = arith.constant 0 : index
    %73 = vector.load %arg13[%c1_91, %c0_92] : memref<16x256xf32, #tpu.memory_space<vmem>>, vector<1x256xf32>
    tpu.vector_store %arg13[%c1_91, %c0_92], %72 {strides = array<i32>} : memref<16x256xf32, #tpu.memory_space<vmem>>, vector<1x256xf32>,
    %74 = vector.extract_strided_slice %71 {offsets = [1, 0], sizes = [1, 256], strides = [1, 1]} : vector<8x256xf32> to vector<1x256xf32>
    %c3 = arith.constant 3 : index
    %c0_93 = arith.constant 0 : index
    %75 = vector.load %arg13[%c3, %c0_93] : memref<16x256xf32, #tpu.memory_space<vmem>>, vector<1x256xf32>
    tpu.vector_store %arg13[%c3, %c0_93], %74 {strides = array<i32>} : memref<16x256xf32, #tpu.memory_space<vmem>>, vector<1x256xf32>,
    %76 = vector.extract_strided_slice %71 {offsets = [2, 0], sizes = [1, 256], strides = [1, 1]} : vector<8x256xf32> to vector<1x256xf32>
    %c5 = arith.constant 5 : index
    %c0_94 = arith.constant 0 : index
    %77 = vector.load %arg13[%c5, %c0_94] : memref<16x256xf32, #tpu.memory_space<vmem>>, vector<1x256xf32>
    tpu.vector_store %arg13[%c5, %c0_94], %76 {strides = array<i32>} : memref<16x256xf32, #tpu.memory_space<vmem>>, vector<1x256xf32>,
    %78 = vector.extract_strided_slice %71 {offsets = [3, 0], sizes = [1, 256], strides = [1, 1]} : vector<8x256xf32> to vector<1x256xf32>
    %c7 = arith.constant 7 : index
    %c0_95 = arith.constant 0 : index
    %79 = vector.load %arg13[%c7, %c0_95] : memref<16x256xf32, #tpu.memory_space<vmem>>, vector<1x256xf32>
    tpu.vector_store %arg13[%c7, %c0_95], %78 {strides = array<i32>} : memref<16x256xf32, #tpu.memory_space<vmem>>, vector<1x256xf32>,
    %80 = vector.extract_strided_slice %71 {offsets = [4, 0], sizes = [1, 256], strides = [1, 1]} : vector<8x256xf32> to vector<1x256xf32>
    %c9 = arith.constant 9 : index
    %c0_96 = arith.constant 0 : index
    %81 = vector.load %arg13[%c9, %c0_96] : memref<16x256xf32, #tpu.memory_space<vmem>>, vector<1x256xf32>
    tpu.vector_store %arg13[%c9, %c0_96], %80 {strides = array<i32>} : memref<16x256xf32, #tpu.memory_space<vmem>>, vector<1x256xf32>,
    %82 = vector.extract_strided_slice %71 {offsets = [5, 0], sizes = [1, 256], strides = [1, 1]} : vector<8x256xf32> to vector<1x256xf32>
    %c11 = arith.constant 11 : index
    %c0_97 = arith.constant 0 : index
    %83 = vector.load %arg13[%c11, %c0_97] : memref<16x256xf32, #tpu.memory_space<vmem>>, vector<1x256xf32>
    tpu.vector_store %arg13[%c11, %c0_97], %82 {strides = array<i32>} : memref<16x256xf32, #tpu.memory_space<vmem>>, vector<1x256xf32>,
    %84 = vector.extract_strided_slice %71 {offsets = [6, 0], sizes = [1, 256], strides = [1, 1]} : vector<8x256xf32> to vector<1x256xf32>
    %c13 = arith.constant 13 : index
    %c0_98 = arith.constant 0 : index
    %85 = vector.load %arg13[%c13, %c0_98] : memref<16x256xf32, #tpu.memory_space<vmem>>, vector<1x256xf32>
    tpu.vector_store %arg13[%c13, %c0_98], %84 {strides = array<i32>} : memref<16x256xf32, #tpu.memory_space<vmem>>, vector<1x256xf32>,
    %86 = vector.extract_strided_slice %71 {offsets = [7, 0], sizes = [1, 256], strides = [1, 1]} : vector<8x256xf32> to vector<1x256xf32>
    %c15 = arith.constant 15 : index
    %c0_99 = arith.constant 0 : index
    %87 = vector.load %arg13[%c15, %c0_99] : memref<16x256xf32, #tpu.memory_space<vmem>>, vector<1x256xf32>
    tpu.vector_store %arg13[%c15, %c0_99], %86 {strides = array<i32>} : memref<16x256xf32, #tpu.memory_space<vmem>>, vector<1x256xf32>,
    %cst_100 = arith.constant 0.000000e+00 : f32
    %88 = vector.broadcast %cst_100 : f32 to vector<2x32xf32>
    %c0_101 = arith.constant 0 : index
    %c0_102 = arith.constant 0 : index
    %89 = vector.load %arg13[%c0_101, %c0_102] : memref<16x256xf32, #tpu.memory_space<vmem>>, vector<2x256xf32>
    %90 = arith.truncf %89 : vector<2x256xf32> to vector<2x256xbf16>
    %c0_103 = arith.constant 0 : index
    %c0_104 = arith.constant 0 : index
    %91 = vector.load %arg4[%c0_103, %c0_104] : memref<2048x32xbf16, #tpu.memory_space<vmem>>, vector<256x32xbf16>
    %cst_105 = arith.constant dense<0.000000e+00> : vector<2x32xf32>
    %92 = tpu.matmul %90, %91, %cst_105 {dimension_numbers = #tpu.dot_dimension_numbers<[1], [0], [0], [1], [0, 0, 1, 1], [], []>} : vector<2x256xbf16>, vector<256x32xbf16>, vector<2x32xf32> -> vector<2x32xf32>
    %93 = arith.addf %88, %92 : vector<2x32xf32>
    %c2_106 = arith.constant 2 : index
    %c0_107 = arith.constant 0 : index
    %94 = vector.load %arg13[%c2_106, %c0_107] : memref<16x256xf32, #tpu.memory_space<vmem>>, vector<2x256xf32>
    %95 = arith.truncf %94 : vector<2x256xf32> to vector<2x256xbf16>
    %c256_108 = arith.constant 256 : index
    %c0_109 = arith.constant 0 : index
    %96 = vector.load %arg4[%c256_108, %c0_109] : memref<2048x32xbf16, #tpu.memory_space<vmem>>, vector<256x32xbf16>
    %cst_110 = arith.constant dense<0.000000e+00> : vector<2x32xf32>
    %97 = tpu.matmul %95, %96, %cst_110 {dimension_numbers = #tpu.dot_dimension_numbers<[1], [0], [0], [1], [0, 0, 1, 1], [], []>} : vector<2x256xbf16>, vector<256x32xbf16>, vector<2x32xf32> -> vector<2x32xf32>
    %98 = arith.addf %93, %97 : vector<2x32xf32>
    %c4_111 = arith.constant 4 : index
    %c0_112 = arith.constant 0 : index
    %99 = vector.load %arg13[%c4_111, %c0_112] : memref<16x256xf32, #tpu.memory_space<vmem>>, vector<2x256xf32>
    %100 = arith.truncf %99 : vector<2x256xf32> to vector<2x256xbf16>
    %c512 = arith.constant 512 : index
    %c0_113 = arith.constant 0 : index
    %101 = vector.load %arg4[%c512, %c0_113] : memref<2048x32xbf16, #tpu.memory_space<vmem>>, vector<256x32xbf16>
    %cst_114 = arith.constant dense<0.000000e+00> : vector<2x32xf32>
    %102 = tpu.matmul %100, %101, %cst_114 {dimension_numbers = #tpu.dot_dimension_numbers<[1], [0], [0], [1], [0, 0, 1, 1], [], []>} : vector<2x256xbf16>, vector<256x32xbf16>, vector<2x32xf32> -> vector<2x32xf32>
    %103 = arith.addf %98, %102 : vector<2x32xf32>
    %c6_115 = arith.constant 6 : index
    %c0_116 = arith.constant 0 : index
    %104 = vector.load %arg13[%c6_115, %c0_116] : memref<16x256xf32, #tpu.memory_space<vmem>>, vector<2x256xf32>
    %105 = arith.truncf %104 : vector<2x256xf32> to vector<2x256xbf16>
    %c768 = arith.constant 768 : index
    %c0_117 = arith.constant 0 : index
    %106 = vector.load %arg4[%c768, %c0_117] : memref<2048x32xbf16, #tpu.memory_space<vmem>>, vector<256x32xbf16>
    %cst_118 = arith.constant dense<0.000000e+00> : vector<2x32xf32>
    %107 = tpu.matmul %105, %106, %cst_118 {dimension_numbers = #tpu.dot_dimension_numbers<[1], [0], [0], [1], [0, 0, 1, 1], [], []>} : vector<2x256xbf16>, vector<256x32xbf16>, vector<2x32xf32> -> vector<2x32xf32>
    %108 = arith.addf %103, %107 : vector<2x32xf32>
    %c8_119 = arith.constant 8 : index
    %c0_120 = arith.constant 0 : index
    %109 = vector.load %arg13[%c8_119, %c0_120] : memref<16x256xf32, #tpu.memory_space<vmem>>, vector<2x256xf32>
    %110 = arith.truncf %109 : vector<2x256xf32> to vector<2x256xbf16>
    %c1024 = arith.constant 1024 : index
    %c0_121 = arith.constant 0 : index
    %111 = vector.load %arg4[%c1024, %c0_121] : memref<2048x32xbf16, #tpu.memory_space<vmem>>, vector<256x32xbf16>
    %cst_122 = arith.constant dense<0.000000e+00> : vector<2x32xf32>
    %112 = tpu.matmul %110, %111, %cst_122 {dimension_numbers = #tpu.dot_dimension_numbers<[1], [0], [0], [1], [0, 0, 1, 1], [], []>} : vector<2x256xbf16>, vector<256x32xbf16>, vector<2x32xf32> -> vector<2x32xf32>
    %113 = arith.addf %108, %112 : vector<2x32xf32>
    %c10_123 = arith.constant 10 : index
    %c0_124 = arith.constant 0 : index
    %114 = vector.load %arg13[%c10_123, %c0_124] : memref<16x256xf32, #tpu.memory_space<vmem>>, vector<2x256xf32>
    %115 = arith.truncf %114 : vector<2x256xf32> to vector<2x256xbf16>
    %c1280 = arith.constant 1280 : index
    %c0_125 = arith.constant 0 : index
    %116 = vector.load %arg4[%c1280, %c0_125] : memref<2048x32xbf16, #tpu.memory_space<vmem>>, vector<256x32xbf16>
    %cst_126 = arith.constant dense<0.000000e+00> : vector<2x32xf32>
    %117 = tpu.matmul %115, %116, %cst_126 {dimension_numbers = #tpu.dot_dimension_numbers<[1], [0], [0], [1], [0, 0, 1, 1], [], []>} : vector<2x256xbf16>, vector<256x32xbf16>, vector<2x32xf32> -> vector<2x32xf32>
    %118 = arith.addf %113, %117 : vector<2x32xf32>
    %c12_127 = arith.constant 12 : index
    %c0_128 = arith.constant 0 : index
    %119 = vector.load %arg13[%c12_127, %c0_128] : memref<16x256xf32, #tpu.memory_space<vmem>>, vector<2x256xf32>
    %120 = arith.truncf %119 : vector<2x256xf32> to vector<2x256xbf16>
    %c1536 = arith.constant 1536 : index
    %c0_129 = arith.constant 0 : index
    %121 = vector.load %arg4[%c1536, %c0_129] : memref<2048x32xbf16, #tpu.memory_space<vmem>>, vector<256x32xbf16>
    %cst_130 = arith.constant dense<0.000000e+00> : vector<2x32xf32>
    %122 = tpu.matmul %120, %121, %cst_130 {dimension_numbers = #tpu.dot_dimension_numbers<[1], [0], [0], [1], [0, 0, 1, 1], [], []>} : vector<2x256xbf16>, vector<256x32xbf16>, vector<2x32xf32> -> vector<2x32xf32>
    %123 = arith.addf %118, %122 : vector<2x32xf32>
    %c14_131 = arith.constant 14 : index
    %c0_132 = arith.constant 0 : index
    %124 = vector.load %arg13[%c14_131, %c0_132] : memref<16x256xf32, #tpu.memory_space<vmem>>, vector<2x256xf32>
    %125 = arith.truncf %124 : vector<2x256xf32> to vector<2x256xbf16>
    %c1792 = arith.constant 1792 : index
    %c0_133 = arith.constant 0 : index
    %126 = vector.load %arg4[%c1792, %c0_133] : memref<2048x32xbf16, #tpu.memory_space<vmem>>, vector<256x32xbf16>
    %cst_134 = arith.constant dense<0.000000e+00> : vector<2x32xf32>
    %127 = tpu.matmul %125, %126, %cst_134 {dimension_numbers = #tpu.dot_dimension_numbers<[1], [0], [0], [1], [0, 0, 1, 1], [], []>} : vector<2x256xbf16>, vector<256x32xbf16>, vector<2x32xf32> -> vector<2x32xf32>
    %128 = arith.addf %123, %127 : vector<2x32xf32>
    %c0_135 = arith.constant 0 : index
    %c0_136 = arith.constant 0 : index
    %129 = vector.load %arg5[%c0_135, %c0_136] : memref<1x32xf32, #tpu.memory_space<vmem>>, vector<1x32xf32>
    %130 = vector.broadcast %129 : vector<1x32xf32> to vector<2x32xf32>
    %131 = arith.addf %128, %130 : vector<2x32xf32>
    %cst_137 = arith.constant 0.000000e+00 : f32
    %132 = vector.broadcast %cst_137 : f32 to vector<2x32xf32>
    %133 = arith.maximumf %131, %132 : vector<2x32xf32>
    %c0_138 = arith.constant 0 : index
    %c0_139 = arith.constant 0 : index
    %134 = vector.load %arg6[%c0_138, %c0_139] : memref<32x32xf32, #tpu.memory_space<vmem>>, vector<32x32xf32>
    %cst_140 = arith.constant dense<0.000000e+00> : vector<2x32xf32>
    %135 = tpu.matmul %133, %134, %cst_140 {dimension_numbers = #tpu.dot_dimension_numbers<[1], [0], [0], [1], [0, 0, 1, 1], [], []>} : vector<2x32xf32>, vector<32x32xf32>, vector<2x32xf32> -> vector<2x32xf32>
    %c0_141 = arith.constant 0 : index
    %c0_142 = arith.constant 0 : index
    %136 = vector.load %arg7[%c0_141, %c0_142] : memref<1x32xf32, #tpu.memory_space<vmem>>, vector<1x32xf32>
    %137 = vector.broadcast %136 : vector<1x32xf32> to vector<2x32xf32>
    %138 = arith.addf %135, %137 : vector<2x32xf32>
    %cst_143 = arith.constant 0.000000e+00 : f32
    %139 = vector.broadcast %cst_143 : f32 to vector<2x32xf32>
    %140 = arith.maximumf %138, %139 : vector<2x32xf32>
    %c0_144 = arith.constant 0 : index
    %c0_145 = arith.constant 0 : index
    %141 = vector.load %arg8[%c0_144, %c0_145] : memref<32x7xf32, #tpu.memory_space<vmem>>, vector<32x7xf32>
    %cst_146 = arith.constant dense<0.000000e+00> : vector<2x7xf32>
    %142 = tpu.matmul %140, %141, %cst_146 {dimension_numbers = #tpu.dot_dimension_numbers<[1], [0], [0], [1], [0, 0, 1, 1], [], []>} : vector<2x32xf32>, vector<32x7xf32>, vector<2x7xf32> -> vector<2x7xf32>
    %c0_147 = arith.constant 0 : index
    %c0_148 = arith.constant 0 : index
    %143 = vector.load %arg9[%c0_147, %c0_148] : memref<1x7xf32, #tpu.memory_space<vmem>>, vector<1x7xf32>
    %144 = vector.broadcast %143 : vector<1x7xf32> to vector<2x7xf32>
    %145 = arith.addf %142, %144 : vector<2x7xf32>
    %146 = vector.extract_strided_slice %145 {offsets = [0, 0], sizes = [2, 1], strides = [1, 1]} : vector<2x7xf32> to vector<2x1xf32>
    %147 = vector.extract_strided_slice %145 {offsets = [0, 1], sizes = [2, 6], strides = [1, 1]} : vector<2x7xf32> to vector<2x6xf32>
    %148 = vector.broadcast %146 : vector<2x1xf32> to vector<2x6xf32>
    %149 = arith.addf %148, %147 : vector<2x6xf32>
    %cst_149 = arith.constant dense<0.000000e+00> : vector<2xf32>
    %150 = vector.multi_reduction <add>, %147, %cst_149 [1] : vector<2x6xf32> to vector<2xf32>
    %151 = vector.shape_cast %150 : vector<2xf32> to vector<2x1xf32>
    %cst_150 = arith.constant 6.000000e+00 : f32
    %152 = vector.broadcast %cst_150 : f32 to vector<2x1xf32>
    %153 = arith.divf %151, %152 : vector<2x1xf32>
    %154 = vector.broadcast %153 : vector<2x1xf32> to vector<2x6xf32>
    %155 = arith.subf %149, %154 : vector<2x6xf32>
    %c0_151 = arith.constant 0 : index
    %c0_152 = arith.constant 0 : index
    %156 = vector.load %arg10[%c0_151, %c0_152] : memref<2x6xf32, #tpu.memory_space<vmem>>, vector<2x6xf32>
    tpu.vector_store %arg10[%c0_151, %c0_152], %155 {strides = array<i32>} : memref<2x6xf32, #tpu.memory_space<vmem>>, vector<2x6xf32>,
    return
  }
  func.func @transform_0(%arg0: i32) -> (i32, i32) {
    %c0_i32 = arith.constant 0 : i32
    %c0_i32_0 = arith.constant 0 : i32
    %c0_i32_1 = arith.constant 0 : i32
    return %c0_i32, %c0_i32_0 : i32, i32
  }
  func.func @transform_1(%arg0: i32) -> (i32, i32) {
    %c0_i32 = arith.constant 0 : i32
    %c0_i32_0 = arith.constant 0 : i32
    %c0_i32_1 = arith.constant 0 : i32
    return %c0_i32, %c0_i32_0 : i32, i32
  }
  func.func @transform_2(%arg0: i32) -> (i32, i32) {
    %c0_i32 = arith.constant 0 : i32
    %c0_i32_0 = arith.constant 0 : i32
    %c0_i32_1 = arith.constant 0 : i32
    return %c0_i32, %c0_i32_0 : i32, i32
  }
  func.func @transform_3(%arg0: i32) -> (i32, i32) {
    %c0_i32 = arith.constant 0 : i32
    %c0_i32_0 = arith.constant 0 : i32
    %c0_i32_1 = arith.constant 0 : i32
    return %c0_i32, %c0_i32_0 : i32, i32
  }
  func.func @transform_4(%arg0: i32) -> (i32, i32) {
    %c0_i32 = arith.constant 0 : i32
    %c0_i32_0 = arith.constant 0 : i32
    %c0_i32_1 = arith.constant 0 : i32
    return %c0_i32, %c0_i32_0 : i32, i32
  }
  func.func @transform_5(%arg0: i32) -> (i32, i32) {
    %c0_i32 = arith.constant 0 : i32
    %c0_i32_0 = arith.constant 0 : i32
    %c0_i32_1 = arith.constant 0 : i32
    return %c0_i32, %c0_i32_0 : i32, i32
  }
  func.func @transform_6(%arg0: i32) -> (i32, i32) {
    %c0_i32 = arith.constant 0 : i32
    %c0_i32_0 = arith.constant 0 : i32
    %c0_i32_1 = arith.constant 0 : i32
    return %c0_i32, %c0_i32_0 : i32, i32
  }
  func.func @transform_7(%arg0: i32) -> (i32, i32) {
    %c0_i32 = arith.constant 0 : i32
    %c0_i32_0 = arith.constant 0 : i32
    %c0_i32_1 = arith.constant 0 : i32
    return %c0_i32, %c0_i32_0 : i32, i32
  }
  func.func @transform_8(%arg0: i32) -> (i32, i32) {
    %c0_i32 = arith.constant 0 : i32
    %c0_i32_0 = arith.constant 0 : i32
    %c0_i32_1 = arith.constant 0 : i32
    return %c0_i32, %c0_i32_0 : i32, i32
  }
  func.func @transform_9(%arg0: i32) -> (i32, i32) {
    %c0_i32 = arith.constant 0 : i32
    %c0_i32_0 = arith.constant 0 : i32
    %c0_i32_1 = arith.constant 0 : i32
    return %c0_i32, %c0_i32_0 : i32, i32
  }
}

</mosaic_0001>

<bundles_post_ra>
// kernel: tpu_custom_call.1
= control target key start
LH: loop header
LB: loop body
LE: loop exit
PB: predicated region body
PF: predicated region fallthrough
CT: control target
= control target key end

     0   :  { %v2956_v2 = vmov 0.0   ;;  %s2957_s13 = smov 126   ;;  %s2959_s14 = smov 112   ;;  %s3606_s0 = inlined_call_operand.vmem [shape: f32[8,256], index: 0, kind: input, shape index: {}]   ;;  %s3607_s1 = inlined_call_operand.vmem [shape: f32[8,36], index: 1, kind: input, shape index: {}]   ;;  %s3608_s2 = inlined_call_operand.vmem [shape: f32[8,1], index: 2, kind: input, shape index: {}]   ;;  %s3609_s3 = inlined_call_operand.vmem [shape: bf16[2048,32], index: 3, kind: input, shape index: {}]   ;;  %s3610_s4 = inlined_call_operand.vmem [shape: f32[1,32], index: 4, kind: input, shape index: {}]   ;;  %s3611_s5 = inlined_call_operand.vmem [shape: f32[32,32], index: 5, kind: input, shape index: {}]   ;;  %s3612_s6 = inlined_call_operand.vmem [shape: f32[1,32], index: 6, kind: input, shape index: {}]   ;;  %s3613_s7 = inlined_call_operand.vmem [shape: f32[32,7], index: 7, kind: input, shape index: {}]   ;;  %s3614_s8 = inlined_call_operand.vmem [shape: f32[1,7], index: 8, kind: input, shape index: {}]   ;;  %s3615_s9 = inlined_call_operand.hbm [shape: f32[2,6], index: 9, kind: output, shape index: {}]  }
   0x1   :  { %v35_v0 = vld [vmem:[%s3606_s0 + $0x8] sm:$0xff]  ;;  %v34_v1 = vld [vmem:[%s3606_s0] sm:$0xff]  ;;  %38 = vst [vmem:[#allocation2 + $0x10] sm:$0xff] %v2956_v2  ;;  %300 = vmatprep.mubr.f32.mxu0 %v2956_v2  ;;  %652 = vmatprep.mubr.f32.mxu1 %v2956_v2  ;;  %s2958_s0 = smov 127   ;;  %s2960_s15 = smov 111  }
   0x2   :  { %37 = vst [vmem:[#allocation2 + $0x8] sm:$0xff] %v35_v0  ;;  %36 = vst [vmem:[#allocation2] sm:$0xff] %v34_v1  ;;  %s2961_s16 = smov 110   ;;  %s2962_s17 = smov 96  }
   0x3   :  { %s2963_s18 = smov 95   ;;  %s2964_s19 = smov 94  }
   0x8   :  { %v68_v5 = vld [vmem:[#allocation2 + $0x10] sm:$0xf]  ;;  %v426_v7 = vld [vmem:[#allocation2 + $0x10] sm:$0xf0] }
   0x9   :  { %v67_v3 = vld [vmem:[#allocation2 + $0x8] sm:$0xf]  ;;  %v46_v8 = vld [vmem:[#allocation2 + $0x10] sm:$0xf]  ;;  %v432_v9 = vrot.slane %v426_v7, 4 }
   0xa   :  { %v45_v4 = vld [vmem:[#allocation2 + $0x8] sm:$0xf]  ;;  %74 = vrot.lane.b32.xlu1 %v67_v3, %s2957_s13  ;;  %v52_v10 = vrot.slane %v46_v8, 4  ;;  %v408_v11 = vld [vmem:[#allocation2 + $0x10] sm:$0xf0] }
   0xb   :  { %v51_v6 = vrot.slane %v45_v4, 4  ;;  %v87_v12 = vld [vmem:[#allocation2 + $0x10] sm:$0xf]  ;;  %v447_v14 = vld [vmem:[#allocation2 + $0x10] sm:$0xf0]  ;;  %v2771_v15 = vpack.i.bf16 %v432_v9, %v68_v5 }
   0xc   :  { %v93_v13 = vrot.slane %v87_v12, 4  ;;  %v2766_v16 = vpack.i.bf16 %v408_v11, %v52_v10  ;;  %v86_v17 = vld [vmem:[#allocation2 + $0x8] sm:$0xf]  ;;  %v44_v20 = vld [vmem:[#allocation2] sm:$0xf] }
   0xd   :  { %55 = vrot.lane.b32.xlu0 %v51_v6, %s2958_s0  ;;  %v92_v19 = vrot.slane %v86_v17, 4  ;;  %v66_v21 = vld [vmem:[#allocation2] sm:$0xf]  ;;  %v50_v22 = vrot.slane %v44_v20, 4  ;;  %v465_v24 = vld [vmem:[#allocation2 + $0x10] sm:$0xf0] }
   0xe   :  { %2772 = vrot.lane.b32.xlu1 %v2771_v15, %s2957_s13  ;;  %v2776_v18 = vpack.i.bf16 %v447_v14, %v93_v13  ;;  %v85_v23 = vld [vmem:[#allocation2] sm:$0xf]  ;;  %v108_v25 = vld [vmem:[#allocation2 + $0x8] sm:$0xf]  ;;  %v471_v28 = vrot.slane %v465_v24, 4 }
   0xf   :  { %v91_v26 = vrot.slane %v85_v23, 4  ;;  %v127_v27 = vld [vmem:[#allocation2 + $0x8] sm:$0xf]  ;;  %v109_v29 = vld [vmem:[#allocation2 + $0x10] sm:$0xf]  ;;  %v219_v20 = vld [vmem:[%s3608_s2] sm:$0xff] }
  0x10   :  { %v128_v30 = vld [vmem:[#allocation2 + $0x10] sm:$0xf]  ;;  %v133_v31 = vrot.slane %v127_v27, 4  ;;  %v2781_v32 = vpack.i.bf16 %v471_v28, %v109_v29  ;;  %v486_v34 = vld [vmem:[#allocation2 + $0x10] sm:$0xf0] }
  0x11   :  { %2767 = vrot.lane.b32.xlu0 %v2766_v16, %s2958_s0  ;;  %v134_v33 = vrot.slane %v128_v30, 4  ;;  %v168_v35 = vld [vmem:[#allocation2 + $0x8] sm:$0xf]  ;;  %v504_v36 = vld [vmem:[#allocation2 + $0x10] sm:$0xf0] }
  0x12   :  { %2777 = vrot.lane.b32.xlu1 %v2776_v18, %s2959_s14  ;;  %v169_v37 = vld [vmem:[#allocation2 + $0x10] sm:$0xf]  ;;  %v149_v38 = vld [vmem:[#allocation2 + $0x8] sm:$0xf]  ;;  %v126_v39 = vld [vmem:[#allocation2] sm:$0xf] }
  0x13   :  { %v167_v40 = vld [vmem:[#allocation2] sm:$0xf]  ;;  %v425_v41 = vld [vmem:[#allocation2 + $0x8] sm:$0xf0]  ;;  %v424_v42 = vld [vmem:[#allocation2] sm:$0xf0]  ;;  %v2786_v45 = vpack.i.bf16 %v486_v34, %v134_v33 }
  0x14   :  { %v464_v43 = vld [vmem:[#allocation2 + $0x8] sm:$0xf0]  ;;  %v41_v44 = vld [vmem:[#allocation2 + $0x8] sm:$0xf]  ;;  %v174_v46 = vrot.slane %v168_v35, 4  ;;  %v510_v48 = vrot.slane %v504_v36, 4 }
  0x15   :  { %96 = vrot.lane.b32.xlu0 %v92_v19, %s2959_s14  ;;  %v150_v47 = vld [vmem:[#allocation2 + $0x10] sm:$0xf]  ;;  %43 = vst [vmem:[#allocation3 + $0x8] sm:$0xf] %v41_v44  ;;  %v40_v49 = vld [vmem:[#allocation2] sm:$0xf] }
  0x16   :  { %72 = vrot.lane.b32.xlu1 %v66_v21, %s2957_s13  ;;  %v175_v50 = vrot.slane %v169_v37, 4  ;;  %v132_v51 = vrot.slane %v126_v39, 4  ;;  %v173_v52 = vrot.slane %v167_v40, 4  ;;  %v431_v53 = vrot.slane %v425_v41, 4  ;;  %42 = vst [vmem:[#allocation3] sm:$0xf] %v40_v49 }
  0x17   :  { %v430_v54 = vrot.slane %v424_v42, 4  ;;  %v470_v55 = vrot.slane %v464_v43, 4  ;;  %v525_v56 = vld [vmem:[#allocation2 + $0x10] sm:$0xf0]  ;;  %v2791_v57 = vpack.i.bf16 %v510_v48, %v150_v47  ;;  %v107_v58 = vld [vmem:[#allocation2] sm:$0xf] }
  0x18   :  { %v2796_v59 = vpack.i.bf16 %v525_v56, %v175_v50  ;;  %v148_v60 = vld [vmem:[#allocation2] sm:$0xf]  ;;  %v407_v61 = vld [vmem:[#allocation2 + $0x8] sm:$0xf0]  ;;  %v463_v63 = vld [vmem:[#allocation2] sm:$0xf0] }
  0x19   :  { %53 = vrot.lane.b32.xlu0 %v50_v22, %s2958_s0  ;;  %v503_v62 = vld [vmem:[#allocation2 + $0x8] sm:$0xf0]  ;;  %v469_v2 = vrot.slane %v463_v63, 4  ;;  %v406_v3 = vld [vmem:[#allocation2] sm:$0xf0]  ;;  %v2965_v21 = vmov 0  }
  0x1a   :  { %115 = vrot.lane.b32.xlu1 %v108_v25, %s2960_s15  ;;  %v446_v0 = vld [vmem:[#allocation2 + $0x8] sm:$0xf0]  ;;  %v509_v1 = vrot.slane %v503_v62, 4  ;;  %v190_v4 = vld [vmem:[#allocation2 + $0x8] sm:$0xf]  ;;  %2802 = vset.pattern.permute.xlu0 %v2965_v21 }
  0x1b   :  { %v445_v5 = vld [vmem:[#allocation2] sm:$0xf0]  ;;  %v543_v7 = vld [vmem:[#allocation2 + $0x10] sm:$0xf0]  ;;  %v189_v8 = vld [vmem:[#allocation2] sm:$0xf]  ;;  %2801 = vset.pattern.permute.xlu1 %v2965_v21 }
  0x1c   :  { %v502_v6 = vld [vmem:[#allocation2] sm:$0xf0]  ;;  %v191_v9 = vld [vmem:[#allocation2 + $0x10] sm:$0xf]  ;;  %v549_v11 = vrot.slane %v543_v7, 4 }
  0x1d   :  { %94 = vrot.lane.b32.xlu0 %v91_v26, %s2959_s14  ;;  %v508_v10 = vrot.slane %v502_v6, 4  ;;  %v485_v12 = vld [vmem:[#allocation2 + $0x8] sm:$0xf0]  ;;  %v484_v14 = vld [vmem:[#allocation2] sm:$0xf0] }
  0x1e   :  { %137 = vrot.lane.b32.xlu1 %v133_v31, %s2961_s16  ;;  %v524_v13 = vld [vmem:[#allocation2 + $0x8] sm:$0xf0]  ;;  %v523_v15 = vld [vmem:[#allocation2] sm:$0xf0] }
  0x1f   :  { %v542_v16 = vld [vmem:[#allocation2 + $0x8] sm:$0xf0]  ;;  %v541_v17 = vld [vmem:[#allocation2] sm:$0xf0] }
  0x20   :  { %v548_v18 = vrot.slane %v542_v16, 4  ;;  %v547_v19 = vrot.slane %v541_v17, 4 }
  0x21   :  { %2782 = vrot.lane.b32.xlu0 %v2781_v32, %s2960_s15 }
  0x22   :  { %156 = vrot.lane.b32.xlu1 %v149_v38, %s2962_s17 }
  0x25   :  { %2787 = vrot.lane.b32.xlu0 %v2786_v45, %s2961_s16 }
  0x26   :  { %178 = vrot.lane.b32.xlu1 %v174_v46, %s2963_s18 }
  0x29   :  { %2792 = vrot.lane.b32.xlu0 %v2791_v57, %s2962_s17 }
  0x2a   :  { %113 = vrot.lane.b32.xlu1 %v107_v58, %s2960_s15 }
  0x2d   :  { %2797 = vrot.lane.b32.xlu0 %v2796_v59, %s2963_s18 }
  0x2e   :  { %154 = vrot.lane.b32.xlu1 %v148_v60, %s2962_s17 }
  0x31   :  { %135 = vrot.lane.b32.xlu0 %v132_v51, %s2961_s16 }
  0x32   :  { %414 = vrot.lane.b32.xlu1 %v407_v61, %s2958_s0 }
  0x35   :  { %176 = vrot.lane.b32.xlu0 %v173_v52, %s2963_s18 }
  0x36   :  { %453 = vrot.lane.b32.xlu1 %v446_v0, %s2959_s14 }
  0x39   :  { %435 = vrot.lane.b32.xlu0 %v431_v53, %s2957_s13 }
  0x3a   :  { %433 = vrot.lane.b32.xlu1 %v430_v54, %s2957_s13 }
  0x3d   :  { %412 = vrot.lane.b32.xlu0 %v406_v3, %s2958_s0 }
  0x3e   :  { %197 = vrot.lane.b32.xlu1 %v190_v4, %s2964_s19 }
  0x41   :  { %451 = vrot.lane.b32.xlu0 %v445_v5, %s2959_s14 }
  0x42   :  { %195 = vrot.lane.b32.xlu1 %v189_v8, %s2964_s19 }
  0x45   :  { %199 = vrot.lane.b32.xlu0 %v191_v9, %s2964_s19 }
  0x46   :  { %492 = vrot.lane.b32.xlu1 %v485_v12, %s2961_s16 }
  0x49   :  { %474 = vrot.lane.b32.xlu0 %v470_v55, %s2960_s15 }
  0x4a   :  { %531 = vrot.lane.b32.xlu1 %v524_v13, %s2963_s18 }
  0x4d   :  { %513 = vrot.lane.b32.xlu0 %v509_v1, %s2962_s17 }
  0x4e   :  { %490 = vrot.lane.b32.xlu1 %v484_v14, %s2961_s16 }
  0x51   :  { %472 = vrot.lane.b32.xlu0 %v469_v2, %s2960_s15 }
  0x52   :  { %529 = vrot.lane.b32.xlu1 %v523_v15, %s2963_s18 }
  0x55   :  { %511 = vrot.lane.b32.xlu0 %v508_v10, %s2962_s17 }
  0x56   :  { %554 = vrot.lane.b32.xlu1 %v549_v11, %s2964_s19 }
  0x59   :  { %552 = vrot.lane.b32.xlu0 %v548_v18, %s2964_s19 }
  0x5a   :  { %222 = vperm.xlu1 %2801, %v219_v20  }
  0x5d   :  { %550 = vrot.lane.b32.xlu0 %v547_v19, %s2964_s19 }
  0x61   :  { %576 = vperm.xlu0 %2802, %v219_v20  }
  0x62   :  { %14 = vsyncpa [#allocation6], 0  ;;  %vm78_vm0 = vcmask 1031168   ;;  %vm59_vm1 = vcmask 1039360   ;;  %vm100_vm2 = vcmask 916480   ;;  %vm119_vm3 = vcmask 908288  }
  0x63   :  { %v397_v33 = vld [vmem:[#allocation2 + $0x8] sm:$0xf0]  ;;  %v396_v42 = vld [vmem:[#allocation2] sm:$0xf0]  ;;  %vm141_vm4 = vcmask 900096   ;;  %vm160_vm5 = vcmask 785408  }
  0x64   :  { %v401_v38 = vrot.slane %v397_v33, 4  ;;  %v400_v46 = vrot.slane %v396_v42, 4  ;;  %vm182_vm6 = vcmask 777216   ;;  %vm201_vm7 = vcmask 769024  }
  0x65   :  { %vm229_vm8 = vcmask 1043456   ;;  %vm225_vm9 = vcmask 293888   ;;  %vm2968_vm11 = vmmov 0   ;;  %vm2183_vm12 = vcmask 261120  }
  0x66   :  { %vm2351_vm13 = vcmask 41984  }
  0x7c   :  { %v75_v22 = vpop.permute.xlu1 %74 }
  0x7f   :  { %v56_v23 = vpop.permute.xlu0 %55 }
  0x80   :  { %v3070_v24 = vpop.permute.xlu1 %2772 }
  0x81   :  { %v2774_v25 = vunpack.i.l.bf16 %v3070_v24  ;;  %v2775_v14 = vunpack.i.h.bf16 %v3070_v24 }
  0x83   :  { %v3073_v26 = vpop.permute.xlu0 %2767  ;;  %v80_v28 = vsel %vm78_vm0, %v75_v22, %v2774_v25 }
  0x84   :  { %v2769_v27 = vunpack.i.l.bf16 %v3073_v26  ;;  %v3077_v29 = vpop.permute.xlu1 %2777  ;;  %84 = vst [vmem:[#allocation3 + $0x18] sm:$0xf] %v80_v28  ;;  %v2770_v8 = vunpack.i.h.bf16 %v3073_v26 }
  0x85   :  { %v2779_v31 = vunpack.i.l.bf16 %v3077_v29  ;;  %v2780_v13 = vunpack.i.h.bf16 %v3077_v29 }
  0x86   :  { %v61_v30 = vsel %vm59_vm1, %v56_v23, %v2769_v27 }
  0x87   :  { %v97_v32 = vpop.permute.xlu0 %96  ;;  %65 = vst [vmem:[#allocation3 + $0x8] sm:$0xf0] %v61_v30 }
  0x88   :  { %v102_v34 = vsel %vm100_vm2, %v97_v32, %v2779_v31  ;;  %v73_v35 = vpop.permute.xlu1 %72 }
  0x89   :  { %106 = vst [vmem:[#allocation3 + $0x18] sm:$0xf0] %v102_v34  ;;  %v79_v36 = vsel %vm78_vm0, %v73_v35, %v75_v22 }
  0x8a   :  { %83 = vst [vmem:[#allocation3 + $0x10] sm:$0xf] %v79_v36 }
  0x8b   :  { %v54_v37 = vpop.permute.xlu0 %53 }
  0x8c   :  { %v60_v39 = vsel %vm59_vm1, %v54_v37, %v56_v23  ;;  %v116_v40 = vpop.permute.xlu1 %115 }
  0x8d   :  { %64 = vst [vmem:[#allocation3] sm:$0xf0] %v60_v39 }
  0x8e   :  { %v210_v41 = vld [vmem:[#allocation3 + $0x8] sm:$0xff] }
  0x8f   :  { %v95_v43 = vpop.permute.xlu0 %94  ;;  %405 = vst [vmem:[#allocation3 + $0x8] sm:$0xf] %v401_v38 }
  0x90   :  { %v101_v44 = vsel %vm100_vm2, %v95_v43, %v97_v32  ;;  %v212_v45 = vld [vmem:[#allocation3 + $0x18] sm:$0xff]  ;;  %v138_v47 = vpop.permute.xlu1 %137 }
  0x91   :  { %105 = vst [vmem:[#allocation3 + $0x10] sm:$0xf0] %v101_v44  ;;  %v2724_v48 = vpack.c.bf16 %v212_v45, %v210_v41 }
  0x93   :  { %v3085_v49 = vpop.permute.xlu0 %2782  ;;  %2725 = vmatprep.subr.bf16.mxu0 %v2724_v48 }
  0x94   :  { %v2784_v50 = vunpack.i.l.bf16 %v3085_v49  ;;  %v209_v51 = vld [vmem:[#allocation3] sm:$0xff]  ;;  %v157_v52 = vpop.permute.xlu1 %156 }
  0x95   :  { %404 = vst [vmem:[#allocation3] sm:$0xf] %v400_v46 }
  0x96   :  { %v121_v53 = vsel %vm119_vm3, %v116_v40, %v2784_v50 }
  0x97   :  { %v3089_v54 = vpop.permute.xlu0 %2787  ;;  %125 = vst [vmem:[#allocation3 + $0x28] sm:$0xf] %v121_v53  ;;  %v2805_v53 = vld [vmem:[%s3609_s3 + $0xc0] sm:$0xff]  }
  0x98   :  { %v2789_v55 = vunpack.i.l.bf16 %v3089_v54  ;;  %v211_v56 = vld [vmem:[#allocation3 + $0x10] sm:$0xff]  ;;  %v179_v58 = vpop.permute.xlu1 %178  ;;  %v2790_v39 = vunpack.i.h.bf16 %v3089_v54 }
  0x99   :  { %v2726_v57 = vpack.c.bf16 %v211_v56, %v209_v51  ;;  %v208_v56 = vld [vmem:[%s3607_s1] sm:$0xff] }
  0x9a   :  { %v143_v59 = vsel %vm141_vm4, %v138_v47, %v2789_v55 }
  0x9b   :  { %v3093_v60 = vpop.permute.xlu0 %2792  ;;  %2727 = vmatpush1.bf16.msra.mxu0 %v2726_v57  ;;  %147 = vst [vmem:[#allocation3 + $0x28] sm:$0xf0] %v143_v59  ;;  %v2807_v57 = vld [vmem:[%s3609_s3 + $0x80] sm:$0xff]   ;;  %v2809_v59 = vld [vmem:[%s3609_s3 + $0xc8] sm:$0xff]  }
  0x9c   :  { %v2794_v61 = vunpack.i.l.bf16 %v3093_v60  ;;  %v114_v62 = vpop.permute.xlu1 %113  ;;  %v2795_v50 = vunpack.i.h.bf16 %v3093_v60 }
  0x9d   :  { %v120_v0 = vsel %vm119_vm3, %v114_v62, %v116_v40  ;;  %v2785_v40 = vunpack.i.h.bf16 %v3085_v49 }
  0x9e   :  { %v162_v63 = vsel %vm160_vm5, %v157_v52, %v2794_v61  ;;  %124 = vst [vmem:[#allocation3 + $0x20] sm:$0xf] %v120_v0 }
  0x9f   :  { %v3098_v1 = vpop.permute.xlu0 %2797  ;;  %166 = vst [vmem:[#allocation3 + $0x38] sm:$0xf] %v162_v63 }
  0xa0   :  { %v2799_v2 = vunpack.i.l.bf16 %v3098_v1  ;;  %v155_v3 = vpop.permute.xlu1 %154 }
  0xa1   :  { %v161_v5 = vsel %vm160_vm5, %v155_v3, %v157_v52 }
  0xa2   :  { %v184_v4 = vsel %vm182_vm6, %v179_v58, %v2799_v2  ;;  %165 = vst [vmem:[#allocation3 + $0x30] sm:$0xf] %v161_v5  ;;  %v214_v16 = vld [vmem:[#allocation3 + $0x28] sm:$0xff] }
  0xa3   :  { %v136_v6 = vpop.permute.xlu0 %135  ;;  %188 = vst [vmem:[#allocation3 + $0x38] sm:$0xf0] %v184_v4 }
  0xa4   :  { %v142_v7 = vsel %vm141_vm4, %v136_v6, %v138_v47  ;;  %v415_v9 = vpop.permute.xlu1 %414  ;;  %v2800_v47 = vunpack.i.h.bf16 %v3098_v1 }
  0xa5   :  { %146 = vst [vmem:[#allocation3 + $0x20] sm:$0xf0] %v142_v7  ;;  %v419_v10 = vsel %vm59_vm1, %v415_v9, %v2770_v8 }
  0xa6   :  { %423 = vst [vmem:[#allocation3 + $0x8] sm:$0xf0] %v419_v10 }
  0xa7   :  { %v177_v11 = vpop.permute.xlu0 %176 }
  0xa8   :  { %v183_v12 = vsel %vm182_vm6, %v177_v11, %v179_v58  ;;  %v454_v15 = vpop.permute.xlu1 %453 }
  0xa9   :  { %187 = vst [vmem:[#allocation3 + $0x30] sm:$0xf0] %v183_v12  ;;  %v458_v18 = vsel %vm100_vm2, %v454_v15, %v2780_v13 }
  0xaa   :  { %v216_v17 = vld [vmem:[#allocation3 + $0x38] sm:$0xff]  ;;  %462 = vst [vmem:[#allocation3 + $0x18] sm:$0xf0] %v458_v18 }
  0xab   :  { %v436_v19 = vpop.permute.xlu0 %435  ;;  %v2728_v20 = vpack.c.bf16 %v216_v17, %v214_v16  ;;  %v2803_v16 = vld [vmem:[%s3609_s3 + $0x40] sm:$0xff]  }
  0xac   :  { %v440_v21 = vsel %vm78_vm0, %v436_v19, %v2775_v14  ;;  %v434_v22 = vpop.permute.xlu1 %433  ;;  %v213_v24 = vld [vmem:[#allocation3 + $0x20] sm:$0xff] }
  0xad   :  { %444 = vst [vmem:[#allocation3 + $0x18] sm:$0xf] %v440_v21  ;;  %2729 = vmatprep.subr.bf16.mxu0 %v2728_v20  ;;  %v439_v23 = vsel %vm78_vm0, %v434_v22, %v436_v19  ;;  %v564_v32 = vld [vmem:[#allocation3 + $0x8] sm:$0xff]  ;;  %v2804_v17 = vld [vmem:[%s3609_s3] sm:$0xff]   ;;  %v2810_v21 = vld [vmem:[%s3609_s3 + $0x50] sm:$0xff]  }
  0xae   :  { %443 = vst [vmem:[#allocation3 + $0x10] sm:$0xf] %v439_v23  ;;  %v2806_v19 = vld [vmem:[%s3609_s3 + $0x48] sm:$0xff]   ;;  %v2812_v23 = vld [vmem:[%s3609_s3 + $0x10] sm:$0xff]  }
  0xaf   :  { %v413_v25 = vpop.permute.xlu0 %412  ;;  %v2808_v20 = vld [vmem:[%s3609_s3 + $0x8] sm:$0xff]  }
  0xb0   :  { %v418_v26 = vsel %vm59_vm1, %v413_v25, %v415_v9  ;;  %v215_v27 = vld [vmem:[#allocation3 + $0x30] sm:$0xff]  ;;  %v198_v29 = vpop.permute.xlu1 %197  ;;  %v2811_v22 = vld [vmem:[%s3609_s3 + $0x88] sm:$0xff]  }
  0xb1   :  { %422 = vst [vmem:[#allocation3] sm:$0xf0] %v418_v26  ;;  %v2730_v28 = vpack.c.bf16 %v215_v27, %v213_v24  ;;  %v2813_v25 = vld [vmem:[%s3609_s3 + $0xd0] sm:$0xff]   ;;  %v2814_v26 = vld [vmem:[%s3609_s3 + $0x58] sm:$0xff]  }
  0xb2   :  { %v2815_v24 = vld [vmem:[%s3609_s3 + $0x90] sm:$0xff]   ;;  %v2816_v27 = vld [vmem:[%s3609_s3 + $0x18] sm:$0xff]  }
  0xb3   :  { %v452_v30 = vpop.permute.xlu0 %451  ;;  %2731 = vmatpush1.bf16.msra.mxu0 %v2730_v28  ;;  %v2817_v28 = vld [vmem:[%s3609_s3 + $0xd8] sm:$0xff]  }
  0xb4   :  { %v457_v31 = vsel %vm100_vm2, %v452_v30, %v454_v15  ;;  %v566_v33 = vld [vmem:[#allocation3 + $0x18] sm:$0xff]  ;;  %v196_v35 = vpop.permute.xlu1 %195 }
  0xb5   :  { %461 = vst [vmem:[#allocation3 + $0x10] sm:$0xf0] %v457_v31  ;;  %v2732_v34 = vpack.c.bf16 %v566_v33, %v564_v32  ;;  %v202_v36 = vsel %vm201_vm7, %v196_v35, %v198_v29  ;;  %v2819_v30 = vld [vmem:[%s3609_s3 + $0x98] sm:$0xff]   ;;  %v2820_v31 = vld [vmem:[%s3609_s3 + $0x20] sm:$0xff]   ;;  %v2822_v33 = vld [vmem:[%s3609_s3 + $0x68] sm:$0xff]  }
  0xb6   :  { %206 = vst [vmem:[#allocation3 + $0x40] sm:$0xf] %v202_v36  ;;  %v2821_v32 = vld [vmem:[%s3609_s3 + $0xe0] sm:$0xff]   ;;  %v2824_v35 = vld [vmem:[%s3609_s3 + $0x28] sm:$0xff]  }
  0xb7   :  { %2733 = vmatprep.subr.bf16.mxu1 %v2732_v34  ;;  %v200_v37 = vpop.permute.xlu0 %199  ;;  %v2823_v34 = vld [vmem:[%s3609_s3 + $0xa0] sm:$0xff]   ;;  %v2825_v36 = vld [vmem:[%s3609_s3 + $0xe8] sm:$0xff]  }
  0xb8   :  { %v203_v38 = vsel %vm201_vm7, %v198_v29, %v200_v37  ;;  %v493_v41 = vpop.permute.xlu1 %492  ;;  %v563_v45 = vld [vmem:[#allocation3] sm:$0xff]  ;;  %v2826_v37 = vld [vmem:[%s3609_s3 + $0x70] sm:$0xff]  }
  0xb9   :  { %207 = vst [vmem:[#allocation3 + $0x48] sm:$0xf] %v203_v38  ;;  %v497_v42 = vsel %vm141_vm4, %v493_v41, %v2790_v39  ;;  %v2818_v29 = vld [vmem:[%s3609_s3 + $0x60] sm:$0xff]   ;;  %v2827_v38 = vld [vmem:[%s3609_s3 + $0xa8] sm:$0xff]   ;;  %v2828_v39 = vld [vmem:[%s3609_s3 + $0x30] sm:$0xff]  }
  0xba   :  { %501 = vst [vmem:[#allocation3 + $0x28] sm:$0xf0] %v497_v42  ;;  %v2831_v42 = vld [vmem:[%s3609_s3 + $0xb0] sm:$0xff]  }
  0xbb   :  { %v475_v43 = vpop.permute.xlu0 %474 }
  0xbc   :  { %v479_v44 = vsel %vm119_vm3, %v475_v43, %v2785_v40  ;;  %v565_v46 = vld [vmem:[#allocation3 + $0x10] sm:$0xff]  ;;  %v532_v51 = vpop.permute.xlu1 %531 }
  0xbd   :  { %483 = vst [vmem:[#allocation3 + $0x28] sm:$0xf] %v479_v44  ;;  %v2734_v48 = vpack.c.bf16 %v565_v46, %v563_v45  ;;  %v536_v52 = vsel %vm182_vm6, %v532_v51, %v2800_v47  ;;  %v217_v58 = vld [vmem:[#allocation3 + $0x40] sm:$0xf]  ;;  %v2829_v40 = vld [vmem:[%s3609_s3 + $0xf0] sm:$0xff]   ;;  %v2833_v44 = vld [vmem:[%s3609_s3 + $0xf8] sm:$0xff]  }
  0xbe   :  { %540 = vst [vmem:[#allocation3 + $0x38] sm:$0xf0] %v536_v52  ;;  %v2834_v45 = vld [vmem:[%s3609_s3 + $0x1c0] sm:$0xff]   ;;  %v2835_v46 = vld [vmem:[%s3609_s3 + $0xb8] sm:$0xff]  }
  0xbf   :  { %v514_v49 = vpop.permute.xlu0 %513  ;;  %2735 = vmatpush1.bf16.msra.mxu1 %v2734_v48  ;;  %v2837_v47 = vld [vmem:[%s3609_s3 + $0x140] sm:$0xff]   ;;  %v2966_v48 = vmov 1966171168  }
  0xc0   :  { %v518_v54 = vsel %vm160_vm5, %v514_v49, %v2795_v50  ;;  %v218_v55 = vld [vmem:[#allocation3 + $0x48] sm:$0xf]  ;;  %v491_v60 = vpop.permute.xlu1 %490  ;;  %v313_v50 = vunpack.c.l.s4 %v2966_v48  ;;  %v2839_v48 = vld [vmem:[%s3609_s3 + $0x100] sm:$0xff]  }
  0xc1   :  { %522 = vst [vmem:[#allocation3 + $0x38] sm:$0xf] %v518_v54  ;;  %2377 = vmatprep.subr.msk.mxu0 %vm229_vm8, %v218_v55  ;;  %v496_v61 = vsel %vm141_vm4, %v491_v60, %v493_v41  ;;  %v2830_v41 = vld [vmem:[%s3609_s3 + $0x78] sm:$0xff]  }
  0xc2   :  { %2378 = vmatpush1.msk.msra.mxu0 %vm229_vm8, %v217_v58  ;;  %500 = vst [vmem:[#allocation3 + $0x20] sm:$0xf0] %v496_v61 }
  0xc3   :  { %v473_v62 = vpop.permute.xlu0 %472  ;;  %2379 = vmatmul.mubr.msk.f32.vlgmr.msra.gmra.mrb[0].mxu0 %vm225_vm9, %v208_v56  ;;  %2516 = vmatprep.subr.bf16.mxu0 %v2805_v53  ;;  %v314_v53 = vunpack.c.0.s8 %v313_v50  ;;  %v2840_v50 = vld [vmem:[%s3609_s3 + $0x188] sm:$0xff]  }
  0xc4   :  { %v478_v63 = vsel %vm119_vm3, %v473_v62, %v475_v43  ;;  %2517 = vmatpush3.bf16.msra.mxu0 %v2807_v57  ;;  %v530_v0 = vpop.permute.xlu1 %529  ;;  %v568_v4 = vld [vmem:[#allocation3 + $0x28] sm:$0xff]  ;;  %v2832_v43 = vld [vmem:[%s3609_s3 + $0x38] sm:$0xff]  }
  0xc5   :  { %482 = vst [vmem:[#allocation3 + $0x20] sm:$0xf] %v478_v63  ;;  %2518 = vmatprep.subr.bf16.mxu0 %v2809_v59  ;;  %v535_v1 = vsel %vm182_vm6, %v530_v0, %v532_v51  ;;  %v315_v51 = vlaneseq }
  0xc6   :  { %539 = vst [vmem:[#allocation3 + $0x30] sm:$0xf0] %v535_v1  ;;  %v2853_v1 = vld [vmem:[%s3609_s3 + $0x160] sm:$0xff]  }
  0xc7   :  { %v512_v2 = vpop.permute.xlu0 %511  ;;  %v316_v54 = vshrl.u32 %v315_v51, 7  ;;  %vm3241_vm10 = vcmp.lt.s32.totalorder %v315_v51, 256 }
  0xc8   :  { %v517_v3 = vsel %vm160_vm5, %v512_v2, %v514_v49  ;;  %v570_v5 = vld [vmem:[#allocation3 + $0x38] sm:$0xff]  ;;  %v555_v7 = vpop.permute.xlu1 %554  ;;  %2519 = vmatpush3.bf16.msra.mxu0 %v2811_v22 }
  0xc9   :  { %521 = vst [vmem:[#allocation3 + $0x30] sm:$0xf] %v517_v3  ;;  %v2736_v6 = vpack.c.bf16 %v570_v5, %v568_v4  ;;  %2520 = vmatprep.subr.bf16.mxu0 %v2813_v25  ;;  %v317_v60 = vsub.s32 %v314_v53, %v316_v54  ;;  %v2842_v53 = vld [vmem:[%s3609_s3 + $0x1d0] sm:$0xff]  }
  0xcb   :  { %v553_v8 = vpop.permute.xlu0 %552  ;;  %2737 = vmatprep.subr.bf16.mxu1 %v2736_v6 }
  0xcc   :  { %v557_v9 = vsel %vm201_vm7, %v553_v8, %v555_v7  ;;  %v567_v12 = vld [vmem:[#allocation3 + $0x20] sm:$0xff]  ;;  %2521 = vmatpush3.bf16.msra.mxu0 %v2815_v24 }
  0xcd   :  { %561 = vst [vmem:[#allocation3 + $0x48] sm:$0xf] %v557_v9  ;;  %2522 = vmatprep.subr.bf16.mxu0 %v2817_v28 }
  0xcf   :  { %v551_v10 = vpop.permute.xlu0 %550 }
  0xd0   :  { %v556_v11 = vsel %vm201_vm7, %v551_v10, %v553_v8  ;;  %v569_v13 = vld [vmem:[#allocation3 + $0x30] sm:$0xff]  ;;  %2523 = vmatpush3.bf16.msra.mxu0 %v2819_v30 }
  0xd1   :  { %560 = vst [vmem:[#allocation3 + $0x40] sm:$0xf] %v556_v11  ;;  %v2738_v14 = vpack.c.bf16 %v569_v13, %v567_v12  ;;  %2524 = vmatprep.subr.bf16.mxu0 %v2821_v32 }
  0xd3   :  { %2739 = vmatpush1.bf16.msra.mxu1 %v2738_v14 }
  0xd4   :  { %v572_v15 = vld [vmem:[#allocation3 + $0x48] sm:$0xf]  ;;  %2525 = vmatpush3.bf16.msra.mxu0 %v2823_v34 }
  0xd5   :  { %2380 = vmatprep.subr.msk.mxu1 %vm229_vm8, %v572_v15  ;;  %2526 = vmatprep.subr.bf16.mxu0 %v2825_v36 }
  0xd8   :  { %v571_v18 = vld [vmem:[#allocation3 + $0x40] sm:$0xf]  ;;  %2527 = vmatpush3.bf16.msra.mxu0 %v2827_v38  ;;  %v2838_v38 = vld [vmem:[%s3609_s3 + $0x1c8] sm:$0xff]  }
  0xd9   :  { %2381 = vmatpush1.msk.msra.mxu1 %vm229_vm8, %v571_v18  ;;  %2528 = vmatprep.subr.bf16.mxu0 %v2829_v40  ;;  %v223_v52 = vpop.permute.xlu1 %222 }
  0xda   :  { %2382 = vmatmul.mubr.msk.f32.vlgmr.msra.gmra.mrb[0].mxu1 %vm225_vm9, %v208_v56  ;;  %2538 = vmatprep.subr.bf16.mxu1 %v2803_v16 }
  0xdb   :  { %2539 = vmatpush3.bf16.msra.mxu1 %v2804_v17 }
  0xdc   :  { %2540 = vmatprep.subr.bf16.mxu1 %v2806_v19  ;;  %2529 = vmatpush3.bf16.msra.mxu0 %v2831_v42 }
  0xdd   :  { %2530 = vmatprep.subr.bf16.mxu0 %v2833_v44 }
  0xdf   :  { %2541 = vmatpush3.bf16.msra.mxu1 %v2808_v20 }
  0xe0   :  { %2542 = vmatprep.subr.bf16.mxu1 %v2810_v21  ;;  %2531 = vmatpush3.bf16.msra.mxu0 %v2835_v46  ;;  %v577_v12 = vpop.permute.xlu0 %576 }
  0xe1   :  { %2560 = vmatprep.subr.bf16.mxu0 %v2837_v47 }
  0xe3   :  { %2543 = vmatpush3.bf16.msra.mxu1 %v2812_v23 }
  0xe4   :  { %2544 = vmatprep.subr.bf16.mxu1 %v2814_v26 }
  0xe7   :  { %2545 = vmatpush3.bf16.msra.mxu1 %v2816_v27 }
  0xe8   :  { %2546 = vmatprep.subr.bf16.mxu1 %v2818_v29 }
  0xeb   :  { %2547 = vmatpush3.bf16.msra.mxu1 %v2820_v31 }
  0xec   :  { %2548 = vmatprep.subr.bf16.mxu1 %v2822_v33 }
  0xef   :  { %2549 = vmatpush3.bf16.msra.mxu1 %v2824_v35 }
  0xf0   :  { %2550 = vmatprep.subr.bf16.mxu1 %v2826_v37  ;;  %v2836_v37 = vld [vmem:[%s3609_s3 + $0x180] sm:$0xff]  }
  0xf3   :  { %2551 = vmatpush3.bf16.msra.mxu1 %v2828_v39 }
  0xf4   :  { %2552 = vmatprep.subr.bf16.mxu1 %v2830_v41 }
  0xf7   :  { %2553 = vmatpush3.bf16.msra.mxu1 %v2832_v43 }
  0xf8   :  { %2582 = vmatprep.subr.bf16.mxu1 %v2834_v45 }
 0x196   :  { %v302_v49 = vpop.f32.mrb[0].mxu0 }
 0x197   :  { %v303_v55 = vadd.f32 %v302_v49, %v223_v52  ;;  %v304_v56 = vpop.f32.mrb[1].mxu0  ;;  %v2841_v49 = vld [vmem:[%s3609_s3 + $0x148] sm:$0xff]  }
 0x198   :  { %v305_v57 = vadd.f32 %v304_v56, %v223_v52  ;;  %v2844_v56 = vld [vmem:[%s3609_s3 + $0x190] sm:$0xff]  }
 0x199   :  { %v307_v58 = vmax.f32 %v303_v55, 0.0  ;;  %v2843_v55 = vld [vmem:[%s3609_s3 + $0x108] sm:$0xff]  }
 0x19a   :  { %v308_v59 = vmax.f32 %v305_v57, 0.0  ;;  %v2845_v57 = vld [vmem:[%s3609_s3 + $0x150] sm:$0xff]  }
 0x19c   :  { %v311_v61 = vcombine.low %v307_v58, %v308_v59  ;;  %v355_v62 = vcombine.high %v307_v58, %v308_v59  ;;  %v2846_v58 = vld [vmem:[%s3609_s3 + $0x1d8] sm:$0xff]   ;;  %v2847_v59 = vld [vmem:[%s3609_s3 + $0x110] sm:$0xff]  }
 0x19e   :  { %v318_v63 = vrot.slane %v311_v61, %v317_v60  ;;  %v362_v0 = vrot.slane %v355_v62, %v317_v60  ;;  %v2849_v61 = vld [vmem:[%s3609_s3 + $0x158] sm:$0xff]   ;;  %v2850_v62 = vld [vmem:[%s3609_s3 + $0x1e0] sm:$0xff]  }
 0x1a0   :  { %v325_v2 = vrot.slane %v318_v63, %v317_v60  ;;  %v333_v3 = vcombine.high %v318_v63, %v318_v63  ;;  %v369_v4 = vrot.slane %v362_v0, %v317_v60  ;;  %v374_v5 = vcombine.high %v362_v0, %v362_v0  ;;  %v2851_v63 = vld [vmem:[%s3609_s3 + $0x118] sm:$0xff]   ;;  %v2852_v0 = vld [vmem:[%s3609_s3 + $0x1a0] sm:$0xff]  }
 0x1a2   :  { %331 = vst.msk [vmem:[#allocation4] ss:$8 sm:$0x3] %vm3241_vm10, %v325_v2  ;;  %v340_v6 = vrot.slane %v333_v3, %v317_v60  ;;  %v345_v7 = vcombine.high %v325_v2, %v325_v2  ;;  %372 = vst.msk [vmem:[#allocation4 + $0x10] ss:$8 sm:$0x3] %vm3241_vm10, %v369_v4  ;;  %v381_v8 = vrot.slane %v374_v5, %v317_v60 }
 0x1a3   :  { %v386_v9 = vcombine.high %v369_v4, %v369_v4  ;;  %v2854_v2 = vld [vmem:[%s3609_s3 + $0x1e8] sm:$0xff]   ;;  %v2855_v3 = vld [vmem:[%s3609_s3 + $0x120] sm:$0xff]  }
 0x1a4   :  { %343 = vst.msk [vmem:[#allocation4 + $0x2] ss:$8 sm:$0x3] %vm3241_vm10, %v340_v6  ;;  %348 = vst.msk [vmem:[#allocation4 + $0x4] ss:$8 sm:$0x3] %vm3241_vm10, %v345_v7  ;;  %v350_v10 = vcombine.high %v340_v6, %v340_v6  ;;  %v391_v11 = vcombine.high %v381_v8, %v381_v8 }
 0x1a5   :  { %384 = vst.msk [vmem:[#allocation4 + $0x12] ss:$8 sm:$0x3] %vm3241_vm10, %v381_v8  ;;  %389 = vst.msk [vmem:[#allocation4 + $0x14] ss:$8 sm:$0x3] %vm3241_vm10, %v386_v9 }
 0x1a6   :  { %353 = vst.msk [vmem:[#allocation4 + $0x6] ss:$8 sm:$0x3] %vm3241_vm10, %v350_v10  ;;  %394 = vst.msk [vmem:[#allocation4 + $0x16] ss:$8 sm:$0x3] %vm3241_vm10, %v391_v11 }
 0x1a7   :  { %v2856_v4 = vld [vmem:[%s3609_s3 + $0x1a8] sm:$0xff]   ;;  %v2858_v6 = vld [vmem:[%s3609_s3 + $0x1f0] sm:$0xff]   ;;  %v2862_v10 = vld [vmem:[%s3609_s3 + $0x1f8] sm:$0xff]  }
 0x1a8   :  { %v2857_v5 = vld [vmem:[%s3609_s3 + $0x168] sm:$0xff]   ;;  %v2860_v8 = vld [vmem:[%s3609_s3 + $0x1b0] sm:$0xff]  }
 0x1a9   :  { %v2859_v7 = vld [vmem:[%s3609_s3 + $0x128] sm:$0xff]   ;;  %v2861_v9 = vld [vmem:[%s3609_s3 + $0x170] sm:$0xff]  }
 0x1ad   :  { %v654_v13 = vpop.f32.mrb[0].mxu1 }
 0x1ae   :  { %v655_v14 = vadd.f32 %v654_v13, %v577_v12  ;;  %v656_v15 = vpop.f32.mrb[1].mxu1  ;;  %v2864_v13 = vld [vmem:[%s3609_s3 + $0x1b8] sm:$0xff]  }
 0x1af   :  { %v657_v16 = vadd.f32 %v656_v15, %v577_v12  ;;  %v2863_v12 = vld [vmem:[%s3609_s3 + $0x130] sm:$0xff]   ;;  %v2865_v15 = vld [vmem:[%s3609_s3 + $0x178] sm:$0xff]  }
 0x1b0   :  { %v659_v17 = vmax.f32 %v655_v14, 0.0 }
 0x1b1   :  { %v660_v18 = vmax.f32 %v657_v16, 0.0 }
 0x1b3   :  { %v663_v19 = vcombine.low %v659_v17, %v660_v18  ;;  %v704_v20 = vcombine.high %v659_v17, %v660_v18  ;;  %v2866_v17 = vld [vmem:[%s3609_s3 + $0x2c0] sm:$0xff]  }
 0x1b5   :  { %v670_v21 = vrot.slane %v663_v19, %v317_v60  ;;  %v711_v22 = vrot.slane %v704_v20, %v317_v60  ;;  %v2867_v20 = vld [vmem:[%s3609_s3 + $0x138] sm:$0xff]  }
 0x1b7   :  { %v677_v23 = vrot.slane %v670_v21, %v317_v60  ;;  %v682_v25 = vcombine.high %v670_v21, %v670_v21  ;;  %v718_v26 = vrot.slane %v711_v22, %v317_v60  ;;  %v723_v24 = vcombine.high %v711_v22, %v711_v22  ;;  %v2868_v21 = vld [vmem:[%s3609_s3 + $0x280] sm:$0xff]  }
 0x1b9   :  { %680 = vst.msk [vmem:[#allocation4 + $0x1] ss:$8 sm:$0x3] %vm3241_vm10, %v677_v23  ;;  %v689_v27 = vrot.slane %v682_v25, %v317_v60  ;;  %v694_v28 = vcombine.high %v677_v23, %v677_v23  ;;  %721 = vst.msk [vmem:[#allocation4 + $0x11] ss:$8 sm:$0x3] %vm3241_vm10, %v718_v26  ;;  %v730_v29 = vrot.slane %v723_v24, %v317_v60 }
 0x1ba   :  { %v735_v30 = vcombine.high %v718_v26, %v718_v26  ;;  %v2848_v60 = vld [vmem:[%s3609_s3 + $0x198] sm:$0xff]   ;;  %v2869_v25 = vld [vmem:[%s3609_s3 + $0x240] sm:$0xff]   ;;  %v2870_v26 = vld [vmem:[%s3609_s3 + $0x2c8] sm:$0xff]  }
 0x1bb   :  { %692 = vst.msk [vmem:[#allocation4 + $0x3] ss:$8 sm:$0x3] %vm3241_vm10, %v689_v27  ;;  %697 = vst.msk [vmem:[#allocation4 + $0x5] ss:$8 sm:$0x3] %vm3241_vm10, %v694_v28  ;;  %v699_v31 = vcombine.high %v689_v27, %v689_v27  ;;  %v740_v32 = vcombine.high %v730_v29, %v730_v29 }
 0x1bc   :  { %733 = vst.msk [vmem:[#allocation4 + $0x13] ss:$8 sm:$0x3] %vm3241_vm10, %v730_v29  ;;  %738 = vst.msk [vmem:[#allocation4 + $0x15] ss:$8 sm:$0x3] %vm3241_vm10, %v735_v30 }
 0x1bd   :  { %702 = vst.msk [vmem:[#allocation4 + $0x7] ss:$8 sm:$0x3] %vm3241_vm10, %v699_v31  ;;  %743 = vst.msk [vmem:[#allocation4 + $0x17] ss:$8 sm:$0x3] %vm3241_vm10, %v740_v32 }
 0x1be   :  { %v2871_v28 = vld [vmem:[%s3609_s3 + $0x200] sm:$0xff]   ;;  %v2872_v30 = vld [vmem:[%s3609_s3 + $0x288] sm:$0xff]  }
 0x1bf   :  { %v2873_v31 = vld [vmem:[%s3609_s3 + $0x248] sm:$0xff]  }
 0x1c0   :  { %v746_v33 = vld [vmem:[#allocation4 + $0x8] sm:$0x3]  ;;  %v745_v34 = vld [vmem:[#allocation4] sm:$0x3]  ;;  %v1454_v27 = vld [vmem:[#allocation4 + $0x18] sm:$0x3] }
 0x1c1   :  { %v748_v35 = vpack.c.bf16 %v746_v33, %v746_v33  ;;  %v747_v36 = vpack.c.bf16 %v745_v34, %v745_v34  ;;  %v1456_v32 = vpack.c.bf16 %v1454_v27, %v1454_v27  ;;  %v2874_v33 = vld [vmem:[%s3609_s3 + $0x2d0] sm:$0xff]   ;;  %v2875_v34 = vld [vmem:[%s3609_s3 + $0x208] sm:$0xff]  }
 0x1c2   :  { %v782_v39 = vld [vmem:[#allocation4 + $0x8] sm:$0xc]  ;;  %v781_v40 = vld [vmem:[#allocation4] sm:$0xc]  ;;  %v1096_v41 = vld [vmem:[#allocation4 + $0x8] sm:$0x30] }
 0x1c3   :  { %1087 = vmatprep.mubr.bf16.mxu1 %v748_v35  ;;  %v784_v42 = vpack.c.bf16 %v782_v39, %v782_v39  ;;  %v783_v43 = vpack.c.bf16 %v781_v40, %v781_v40  ;;  %v1098_v44 = vpack.c.bf16 %v1096_v41, %v1096_v41  ;;  %v1627_v14 = vld [vmem:[#allocation4 + $0x18] sm:$0xc]  ;;  %v1095_v18 = vld [vmem:[#allocation4] sm:$0x30]  ;;  %v2880_v39 = vld [vmem:[%s3609_s3 + $0x298] sm:$0xff]  }
 0x1c4   :  { %1088 = vmatmul.mubr.bf16.vlgmr.msra.gmra.mrb[4].mxu1 %v747_v36  ;;  %v1275_v45 = vld [vmem:[#allocation4 + $0x8] sm:$0xc0]  ;;  %v1274_v11 = vld [vmem:[#allocation4] sm:$0xc0]  ;;  %v1629_v19 = vpack.c.bf16 %v1627_v14, %v1627_v14  ;;  %v1097_v23 = vpack.c.bf16 %v1095_v18, %v1095_v18  ;;  %v2882_v41 = vld [vmem:[%s3609_s3 + $0x2e0] sm:$0xff]  }
 0x1c5   :  { %2583 = vmatpush3.bf16.msra.mxu1 %v2836_v37  ;;  %v820_v46 = vrot.slane %v784_v42, 1  ;;  %v819_v47 = vrot.slane %v783_v43, 1  ;;  %v1277_v51 = vpack.c.bf16 %v1275_v45, %v1275_v45  ;;  %v1134_v54 = vrot.slane %v1098_v44, 2  ;;  %v2876_v35 = vld [vmem:[%s3609_s3 + $0x290] sm:$0xff]   ;;  %v2878_v37 = vld [vmem:[%s3609_s3 + $0x2d8] sm:$0xff]   ;;  %v2884_v43 = vld [vmem:[%s3609_s3 + $0x2a0] sm:$0xff]  }
 0x1c6   :  { %2584 = vmatprep.subr.bf16.mxu1 %v2838_v38  ;;  %v1276_v16 = vpack.c.bf16 %v1274_v11, %v1274_v11  ;;  %v1665_v24 = vrot.slane %v1629_v19, 1  ;;  %v1133_v29 = vrot.slane %v1097_v23, 2  ;;  %v2877_v36 = vld [vmem:[%s3609_s3 + $0x250] sm:$0xff]   ;;  %v2881_v40 = vld [vmem:[%s3609_s3 + $0x258] sm:$0xff]   ;;  %v2885_v44 = vld [vmem:[%s3609_s3 + $0x260] sm:$0xff]  }
 0x1c7   :  { %951 = vmatprep.mubr.bf16.mxu0 %v820_v46  ;;  %v1313_v52 = vrot.slane %v1277_v51, 3  ;;  %v2879_v38 = vld [vmem:[%s3609_s3 + $0x210] sm:$0xff]   ;;  %v2883_v42 = vld [vmem:[%s3609_s3 + $0x218] sm:$0xff]   ;;  %v2886_v45 = vld [vmem:[%s3609_s3 + $0x2e8] sm:$0xff]  }
 0x1c8   :  { %952 = vmatmul.mubr.bf16.vlgmr.msra.gmra.mrb[4].mxu0 %v819_v47  ;;  %v1312_v22 = vrot.slane %v1276_v16, 3  ;;  %v2887_v46 = vld [vmem:[%s3609_s3 + $0x220] sm:$0xff]   ;;  %v2888_v47 = vld [vmem:[%s3609_s3 + $0x2a8] sm:$0xff]   ;;  %v2908_v14 = vld [vmem:[%s3609_s3 + $0x390] sm:$0xff]  }
 0x1c9   :  { %2561 = vmatpush3.bf16.msra.mxu0 %v2839_v48  ;;  %2585 = vmatpush3.bf16.msra.mxu1 %v2840_v50  ;;  %v2889_v48 = vld [vmem:[%s3609_s3 + $0x268] sm:$0xff]   ;;  %v2890_v50 = vld [vmem:[%s3609_s3 + $0x2f0] sm:$0xff]   ;;  %v2910_v16 = vld [vmem:[%s3609_s3 + $0x3d8] sm:$0xff]  }
 0x1ca   :  { %1265 = vmatprep.mubr.bf16.mxu0 %v1134_v54  ;;  %1444 = vmatprep.mubr.bf16.mxu1 %v1313_v52  ;;  %v2891_v51 = vld [vmem:[%s3609_s3 + $0x228] sm:$0xff]   ;;  %v2892_v52 = vld [vmem:[%s3609_s3 + $0x2b0] sm:$0xff]   ;;  %v1626_v54 = vld [vmem:[#allocation4 + $0x10] sm:$0xc] }
 0x1cb   :  { %2562 = vmatprep.subr.bf16.mxu0 %v2841_v49  ;;  %2586 = vmatprep.subr.bf16.mxu1 %v2842_v53  ;;  %v2893_v49 = vld [vmem:[%s3609_s3 + $0x270] sm:$0xff]   ;;  %v2894_v53 = vld [vmem:[%s3609_s3 + $0x2f8] sm:$0xff]   ;;  %v2917_v23 = vld [vmem:[%s3609_s3 + $0x360] sm:$0xff]  }
 0x1cc   :  { %v2912_v18 = vld [vmem:[%s3609_s3 + $0x398] sm:$0xff]   ;;  %v2921_v27 = vld [vmem:[%s3609_s3 + $0x368] sm:$0xff]  }
 0x1cd   :  { %2563 = vmatpush3.bf16.msra.mxu0 %v2843_v55  ;;  %2587 = vmatpush3.bf16.msra.mxu1 %v2844_v56  ;;  %v2895_v55 = vld [vmem:[%s3609_s3 + $0x230] sm:$0xff]   ;;  %v1985_v56 = vld [vmem:[#allocation4 + $0x18] sm:$0xc0]  ;;  %v2913_v19 = vld [vmem:[%s3609_s3 + $0x358] sm:$0xff]  }
 0x1ce   :  { %2564 = vmatprep.subr.bf16.mxu0 %v2845_v57  ;;  %2588 = vmatprep.subr.bf16.mxu1 %v2846_v58  ;;  %v2896_v57 = vld [vmem:[%s3609_s3 + $0x2b8] sm:$0xff]  }
 0x1cf   :  { %v2897_v58 = vld [vmem:[%s3609_s3 + $0x278] sm:$0xff]  }
 0x1d1   :  { %2565 = vmatpush3.bf16.msra.mxu0 %v2847_v59  ;;  %2589 = vmatpush3.bf16.msra.mxu1 %v2848_v60  ;;  %v1628_v59 = vpack.c.bf16 %v1626_v54, %v1626_v54  ;;  %v2898_v60 = vld [vmem:[%s3609_s3 + $0x3c0] sm:$0xff]  }
 0x1d2   :  { %2566 = vmatprep.subr.bf16.mxu0 %v2849_v61  ;;  %2590 = vmatprep.subr.bf16.mxu1 %v2850_v62  ;;  %v1987_v61 = vpack.c.bf16 %v1985_v56, %v1985_v56  ;;  %v1806_v62 = vld [vmem:[#allocation4 + $0x18] sm:$0x30] }
 0x1d5   :  { %2567 = vmatpush3.bf16.msra.mxu0 %v2851_v63  ;;  %2591 = vmatpush3.bf16.msra.mxu1 %v2852_v0  ;;  %v2899_v63 = vld [vmem:[%s3609_s3 + $0x238] sm:$0xff]   ;;  %v2900_v0 = vld [vmem:[%s3609_s3 + $0x380] sm:$0xff]  }
 0x1d6   :  { %2568 = vmatprep.subr.bf16.mxu0 %v2853_v1  ;;  %2592 = vmatprep.subr.bf16.mxu1 %v2854_v2  ;;  %v1664_v1 = vrot.slane %v1628_v59, 1  ;;  %v1453_v2 = vld [vmem:[#allocation4 + $0x10] sm:$0x3] }
 0x1d9   :  { %2569 = vmatpush3.bf16.msra.mxu0 %v2855_v3  ;;  %2593 = vmatpush3.bf16.msra.mxu1 %v2856_v4  ;;  %v2901_v3 = vld [vmem:[%s3609_s3 + $0x340] sm:$0xff]   ;;  %v2902_v4 = vld [vmem:[%s3609_s3 + $0x3c8] sm:$0xff]  }
 0x1da   :  { %2570 = vmatprep.subr.bf16.mxu0 %v2857_v5  ;;  %2594 = vmatprep.subr.bf16.mxu1 %v2858_v6  ;;  %v1808_v5 = vpack.c.bf16 %v1806_v62, %v1806_v62  ;;  %v2023_v6 = vrot.slane %v1987_v61, 3 }
 0x1dc   :  { %v1844_v11 = vrot.slane %v1808_v5, 2 }
 0x1dd   :  { %2571 = vmatpush3.bf16.msra.mxu0 %v2859_v7  ;;  %2595 = vmatpush3.bf16.msra.mxu1 %v2860_v8  ;;  %v2903_v7 = vld [vmem:[%s3609_s3 + $0x300] sm:$0xff]   ;;  %v1455_v8 = vpack.c.bf16 %v1453_v2, %v1453_v2 }
 0x1de   :  { %2572 = vmatprep.subr.bf16.mxu0 %v2861_v9  ;;  %2596 = vmatprep.subr.bf16.mxu1 %v2862_v10  ;;  %v2904_v9 = vld [vmem:[%s3609_s3 + $0x388] sm:$0xff]  }
 0x1df   :  { %v2905_v10 = vld [vmem:[%s3609_s3 + $0x348] sm:$0xff]  }
 0x1e1   :  { %2573 = vmatpush3.bf16.msra.mxu0 %v2863_v12  ;;  %2597 = vmatpush3.bf16.msra.mxu1 %v2864_v13  ;;  %v2906_v12 = vld [vmem:[%s3609_s3 + $0x3d0] sm:$0xff]   ;;  %v2907_v13 = vld [vmem:[%s3609_s3 + $0x308] sm:$0xff]  }
 0x1e2   :  { %2574 = vmatprep.subr.bf16.mxu0 %v2865_v15  ;;  %2626 = vmatprep.subr.bf16.mxu1 %v2866_v17  ;;  %v2909_v15 = vld [vmem:[%s3609_s3 + $0x350] sm:$0xff]  }
 0x1e3   :  { %v2911_v17 = vld [vmem:[%s3609_s3 + $0x310] sm:$0xff]  }
 0x1e4   :  { %1445 = vmatmul.mubr.bf16.vlgmr.msra.gmra.mrb[8].mxu1 %v1312_v22  ;;  %v2916_v22 = vld [vmem:[%s3609_s3 + $0x3a0] sm:$0xff]  }
 0x1e5   :  { %2575 = vmatpush3.bf16.msra.mxu0 %v2867_v20  ;;  %2627 = vmatpush3.bf16.msra.mxu1 %v2868_v21  ;;  %v2914_v20 = vld [vmem:[%s3609_s3 + $0x3e0] sm:$0xff]   ;;  %v2915_v21 = vld [vmem:[%s3609_s3 + $0x318] sm:$0xff]  }
 0x1e6   :  { %1796 = vmatprep.mubr.bf16.mxu1 %v1665_v24  ;;  %2604 = vmatprep.subr.bf16.mxu0 %v2869_v25  ;;  %v2918_v25 = vld [vmem:[%s3609_s3 + $0x3e8] sm:$0xff]  }
 0x1e7   :  { %2628 = vmatprep.subr.bf16.mxu1 %v2870_v26  ;;  %v2919_v26 = vld [vmem:[%s3609_s3 + $0x320] sm:$0xff]   ;;  %v2920_v24 = vld [vmem:[%s3609_s3 + $0x3a8] sm:$0xff]  }
 0x1e8   :  { %1266 = vmatmul.mubr.bf16.vlgmr.msra.gmra.mrb[8].mxu0 %v1133_v29  ;;  %v2923_v29 = vld [vmem:[%s3609_s3 + $0x328] sm:$0xff]  }
 0x1e9   :  { %2605 = vmatpush3.bf16.msra.mxu0 %v2871_v28  ;;  %1617 = vmatprep.mubr.bf16.mxu0 %v1456_v32  ;;  %v2922_v28 = vld [vmem:[%s3609_s3 + $0x3f0] sm:$0xff]   ;;  %v2926_v32 = vld [vmem:[%s3609_s3 + $0x3f8] sm:$0xff]  }
 0x1ea   :  { %2629 = vmatpush3.bf16.msra.mxu1 %v2872_v30  ;;  %2606 = vmatprep.subr.bf16.mxu0 %v2873_v31  ;;  %v2924_v30 = vld [vmem:[%s3609_s3 + $0x3b0] sm:$0xff]  }
 0x1eb   :  { %2630 = vmatprep.subr.bf16.mxu1 %v2874_v33  ;;  %v2925_v31 = vld [vmem:[%s3609_s3 + $0x370] sm:$0xff]   ;;  %v1984_v33 = vld [vmem:[#allocation4 + $0x10] sm:$0xc0] }
 0x1ed   :  { %2607 = vmatpush3.bf16.msra.mxu0 %v2875_v34  ;;  %v2927_v34 = vld [vmem:[%s3609_s3 + $0x330] sm:$0xff]  }
 0x1ee   :  { %2631 = vmatpush3.bf16.msra.mxu1 %v2876_v35  ;;  %2608 = vmatprep.subr.bf16.mxu0 %v2877_v36  ;;  %v2928_v35 = vld [vmem:[%s3609_s3 + $0x3b8] sm:$0xff]  }
 0x1ef   :  { %2632 = vmatprep.subr.bf16.mxu1 %v2878_v37  ;;  %v2929_v36 = vld [vmem:[%s3609_s3 + $0x378] sm:$0xff]   ;;  %v1986_v37 = vpack.c.bf16 %v1984_v33, %v1984_v33 }
 0x1f1   :  { %2609 = vmatpush3.bf16.msra.mxu0 %v2879_v38  ;;  %v1805_v38 = vld [vmem:[#allocation4 + $0x10] sm:$0x30] }
 0x1f2   :  { %2633 = vmatpush3.bf16.msra.mxu1 %v2880_v39  ;;  %2610 = vmatprep.subr.bf16.mxu0 %v2881_v40  ;;  %v2930_v39 = vld [vmem:[%s3609_s3 + $0x338] sm:$0xff]   ;;  %v1807_v40 = vpack.c.bf16 %v1805_v38, %v1805_v38 }
 0x1f3   :  { %2634 = vmatprep.subr.bf16.mxu1 %v2882_v41  ;;  %v2022_v41 = vrot.slane %v1986_v37, 3 }
 0x1f5   :  { %2611 = vmatpush3.bf16.msra.mxu0 %v2883_v42  ;;  %v1843_v42 = vrot.slane %v1807_v40, 2  ;;  %v2260_v40 = vld [vmem:[%s3613_s7 + $0x10] sm:$0xff] }
 0x1f6   :  { %2635 = vmatpush3.bf16.msra.mxu1 %v2884_v43  ;;  %2612 = vmatprep.subr.bf16.mxu0 %v2885_v44  ;;  %v2172_v43 = vld [vmem:[%s3611_s5] sm:$0xff]  ;;  %v2173_v44 = vld [vmem:[%s3611_s5 + $0x8] sm:$0xff] }
 0x1f7   :  { %2636 = vmatprep.subr.bf16.mxu1 %v2886_v45  ;;  %v2741_v45 = vpack.c.bf16 %v2173_v44, %v2172_v43  ;;  %v2512_v43 = vld [vmem:[%s3612_s6] ss:$0 sm:$0xff]  ;;  %s2969_s6 = smov [#allocation5]  }
 0x1f9   :  { %2613 = vmatpush3.bf16.msra.mxu0 %v2887_v46  ;;  %v2967_v46 = vmov 0.0|0.0  }
 0x1fa   :  { %2637 = vmatpush3.bf16.msra.mxu1 %v2888_v47  ;;  %2614 = vmatprep.subr.bf16.mxu0 %v2889_v48  ;;  %v2174_v47 = vld [vmem:[%s3611_s5 + $0x10] sm:$0xff]  ;;  %v2175_v48 = vld [vmem:[%s3611_s5 + $0x18] sm:$0xff] }
 0x1fb   :  { %2638 = vmatprep.subr.bf16.mxu1 %v2890_v50  ;;  %v2744_v50 = vpack.c.bf16 %v2175_v48, %v2174_v47  ;;  %v2514_v48 = vld [vmem:[%s3614_s8] ss:$0 sm:$0xff] }
 0x1fd   :  { %2615 = vmatpush3.bf16.msra.mxu0 %v2891_v51  ;;  %v2931_v51 = vld [vmem:[#allocation2 + $0x10] sm:$0xff] }
 0x1fe   :  { %2639 = vmatpush3.bf16.msra.mxu1 %v2892_v52  ;;  %2616 = vmatprep.subr.bf16.mxu0 %v2893_v49  ;;  %v2258_v52 = vld [vmem:[%s3613_s7] sm:$0xff]  ;;  %v2259_v49 = vld [vmem:[%s3613_s7 + $0x8] sm:$0xff] }
 0x1ff   :  { %2640 = vmatprep.subr.bf16.mxu1 %v2894_v53  ;;  %v2747_v53 = vpack.c.bf16 %v2259_v49, %v2258_v52 }
 0x201   :  { %2617 = vmatpush3.bf16.msra.mxu0 %v2895_v55 }
 0x202   :  { %2641 = vmatpush3.bf16.msra.mxu1 %v2896_v57  ;;  %2618 = vmatprep.subr.bf16.mxu0 %v2897_v58 }
 0x203   :  { %2670 = vmatprep.subr.bf16.mxu1 %v2898_v60 }
 0x205   :  { %1797 = vmatmul.mubr.bf16.vlgmr.msra.gmra.mrb[12].mxu1 %v1664_v1  ;;  %2619 = vmatpush3.bf16.msra.mxu0 %v2899_v63 }
 0x206   :  { %2671 = vmatpush3.bf16.msra.mxu1 %v2900_v0  ;;  %2154 = vmatprep.mubr.bf16.mxu1 %v2023_v6 }
 0x207   :  { %2648 = vmatprep.subr.bf16.mxu0 %v2901_v3  ;;  %2672 = vmatprep.subr.bf16.mxu1 %v2902_v4 }
 0x208   :  { %1618 = vmatmul.mubr.bf16.vlgmr.msra.gmra.mrb[12].mxu0 %v1455_v8 }
 0x209   :  { %2649 = vmatpush3.bf16.msra.mxu0 %v2903_v7  ;;  %1975 = vmatprep.mubr.bf16.mxu0 %v1844_v11 }
 0x20a   :  { %2673 = vmatpush3.bf16.msra.mxu1 %v2904_v9  ;;  %2650 = vmatprep.subr.bf16.mxu0 %v2905_v10 }
 0x20b   :  { %2674 = vmatprep.subr.bf16.mxu1 %v2906_v12 }
 0x20d   :  { %2651 = vmatpush3.bf16.msra.mxu0 %v2907_v13 }
 0x20e   :  { %2675 = vmatpush3.bf16.msra.mxu1 %v2908_v14  ;;  %2652 = vmatprep.subr.bf16.mxu0 %v2909_v15 }
 0x20f   :  { %2676 = vmatprep.subr.bf16.mxu1 %v2910_v16 }
 0x211   :  { %2653 = vmatpush3.bf16.msra.mxu0 %v2911_v17 }
 0x212   :  { %2677 = vmatpush3.bf16.msra.mxu1 %v2912_v18  ;;  %2654 = vmatprep.subr.bf16.mxu0 %v2913_v19 }
 0x213   :  { %2678 = vmatprep.subr.bf16.mxu1 %v2914_v20 }
 0x215   :  { %2655 = vmatpush3.bf16.msra.mxu0 %v2915_v21 }
 0x216   :  { %2679 = vmatpush3.bf16.msra.mxu1 %v2916_v22  ;;  %2656 = vmatprep.subr.bf16.mxu0 %v2917_v23 }
 0x217   :  { %2680 = vmatprep.subr.bf16.mxu1 %v2918_v25 }
 0x219   :  { %2657 = vmatpush3.bf16.msra.mxu0 %v2919_v26 }
 0x21a   :  { %2681 = vmatpush3.bf16.msra.mxu1 %v2920_v24  ;;  %2658 = vmatprep.subr.bf16.mxu0 %v2921_v27 }
 0x21b   :  { %2682 = vmatprep.subr.bf16.mxu1 %v2922_v28 }
 0x21d   :  { %2659 = vmatpush3.bf16.msra.mxu0 %v2923_v29 }
 0x21e   :  { %2683 = vmatpush3.bf16.msra.mxu1 %v2924_v30  ;;  %2660 = vmatprep.subr.bf16.mxu0 %v2925_v31 }
 0x21f   :  { %2684 = vmatprep.subr.bf16.mxu1 %v2926_v32 }
 0x221   :  { %2661 = vmatpush3.bf16.msra.mxu0 %v2927_v34 }
 0x222   :  { %2685 = vmatpush3.bf16.msra.mxu1 %v2928_v35  ;;  %2662 = vmatprep.subr.bf16.mxu0 %v2929_v36  ;;  %v2511_v36 = vld [vmem:[%s3610_s4] ss:$0 sm:$0xff] }
 0x223   :  { %2746 = vmatprep.subr.bf16.mxu1 %v2967_v46 }
 0x225   :  { %2155 = vmatmul.mubr.bf16.vlgmr.msra.gmra.mrb[16].mxu1 %v2022_v41  ;;  %2663 = vmatpush3.bf16.msra.mxu0 %v2930_v39  ;;  %v2261_v41 = vld [vmem:[%s3613_s7 + $0x18] sm:$0xff]  ;;  %s2369_s7 = sshll.u32 %s2969_s6, 4  ;;  %s2370_s7 = int_to_ptr.vmem [resolvable:$true] %s2369_s7 }
 0x226   :  { %2740 = vmatprep.subr.bf16.mxu0 %v2967_v46  ;;  %2721 = vmatprep.mubr.msk.f32.mxu1 %vm2968_vm11, %v2931_v51  ;;  %s2932_s8 = scalar_lea.vmem %s2370_s7, 32  ;;  %p2937_p1 = scmp.lt.s32.totalorder %s2370_s7, %s2370_s7 }
 0x227   :  { %2748 = vmatpush3.bf16.msra.mxu1 %v2747_v53  ;;  %p2933_p0 = scmp.ne.s32.totalorder %s2370_s7, %s2932_s8  ;;  %p2938_p2 = scmp.lt.s32.totalorder %s2932_s8, %s2932_s8 }
 0x228   :  { %1976 = vmatmul.mubr.bf16.vlgmr.msra.gmra.mrb[16].mxu0 %v1843_v42  ;;  %2749 = vmatprep.subr.bf16.mxu1 %v2967_v46  ;;  %v2750_v42 = vpack.c.bf16 %v2261_v41, %v2260_v40 }
 0x229   :  { %2742 = vmatpush3.bf16.msra.mxu0 %v2741_v45  ;;  %2710 = vmatprep.mubr.msk.f32.mxu0 %vm2968_vm11, %v2931_v51  ;;  %p2939_p3 = por %p2938_p2, %p2937_p1 }
 0x22a   :  { %2743 = vmatprep.subr.bf16.mxu0 %v2967_v46 }
 0x22b   :  { %2751 = vmatpush3.bf16.msra.mxu1 %v2750_v42  ;;  %p2940_p4 = pnand %p2939_p3, %p2933_p0 }
 0x22d   :  { %2745 = vmatpush3.bf16.msra.mxu0 %v2744_v50 }
 0x297   :  { %v2554_v54 = vpop.f32.mrb[4].mxu1 }
 0x298   :  { %v2555_v55 = vpop.f32.mrb[5].mxu1 }
 0x299   :  { %v2556_v56 = vadd.f32 %v2555_v55, %v2554_v54  ;;  %v2557_v57 = vpop.f32.mrb[6].mxu1 }
 0x29a   :  { %v2558_v58 = vpop.f32.mrb[7].mxu1 }
 0x29b   :  { %v2532_v59 = vpop.f32.mrb[4].mxu0 }
 0x29c   :  { %v2533_v60 = vpop.f32.mrb[5].mxu0 }
 0x29d   :  { %v2534_v61 = vadd.f32 %v2533_v60, %v2532_v59  ;;  %v2535_v62 = vpop.f32.mrb[6].mxu0 }
 0x29e   :  { %v2536_v63 = vpop.f32.mrb[7].mxu0 }
 0x29f   :  { %v1090_v0 = vadd.f32 %v2556_v56, %v2534_v61 }
 0x2b7   :  { %v2598_v1 = vpop.f32.mrb[8].mxu1 }
 0x2b8   :  { %v2599_v2 = vpop.f32.mrb[9].mxu1 }
 0x2b9   :  { %v2600_v3 = vadd.f32 %v2599_v2, %v2598_v1  ;;  %v2601_v4 = vpop.f32.mrb[10].mxu1 }
 0x2ba   :  { %v2602_v5 = vpop.f32.mrb[11].mxu1 }
 0x2bb   :  { %v2576_v6 = vpop.f32.mrb[8].mxu0 }
 0x2bc   :  { %v2577_v7 = vpop.f32.mrb[9].mxu0 }
 0x2bd   :  { %v2578_v8 = vadd.f32 %v2577_v7, %v2576_v6  ;;  %v2579_v9 = vpop.f32.mrb[10].mxu0 }
 0x2be   :  { %v2580_v10 = vpop.f32.mrb[11].mxu0 }
 0x2bf   :  { %v1273_v11 = vadd.f32 %v2578_v8, %v1090_v0 }
 0x2c1   :  { %v1452_v12 = vadd.f32 %v2600_v3, %v1273_v11 }
 0x2d8   :  { %v2642_v13 = vpop.f32.mrb[12].mxu1 }
 0x2d9   :  { %v2643_v14 = vpop.f32.mrb[13].mxu1 }
 0x2da   :  { %v2644_v15 = vadd.f32 %v2643_v14, %v2642_v13  ;;  %v2645_v16 = vpop.f32.mrb[14].mxu1 }
 0x2db   :  { %v2646_v17 = vpop.f32.mrb[15].mxu1  ;;  %v2620_v18 = vpop.f32.mrb[12].mxu0 }
 0x2dc   :  { %v2621_v19 = vpop.f32.mrb[13].mxu0 }
 0x2dd   :  { %v2622_v20 = vadd.f32 %v2621_v19, %v2620_v18  ;;  %v2623_v21 = vpop.f32.mrb[14].mxu0 }
 0x2de   :  { %v2624_v22 = vpop.f32.mrb[15].mxu0 }
 0x2df   :  { %v1625_v23 = vadd.f32 %v2622_v20, %v1452_v12 }
 0x2e1   :  { %v1804_v25 = vadd.f32 %v2644_v15, %v1625_v23 }
 0x2f8   :  { %v2686_v26 = vpop.f32.mrb[16].mxu1 }
 0x2f9   :  { %v2687_v24 = vpop.f32.mrb[17].mxu1 }
 0x2fa   :  { %v2688_v27 = vadd.f32 %v2687_v24, %v2686_v26  ;;  %v2689_v28 = vpop.f32.mrb[18].mxu1 }
 0x2fb   :  { %v2690_v29 = vpop.f32.mrb[19].mxu1  ;;  %v2664_v30 = vpop.f32.mrb[16].mxu0 }
 0x2fc   :  { %v2665_v31 = vpop.f32.mrb[17].mxu0 }
 0x2fd   :  { %v2666_v32 = vadd.f32 %v2665_v31, %v2664_v30  ;;  %v2667_v33 = vpop.f32.mrb[18].mxu0 }
 0x2fe   :  { %v2668_v34 = vpop.f32.mrb[19].mxu0 }
 0x2ff   :  { %v1983_v35 = vadd.f32 %v2666_v32, %v1804_v25 }
 0x301   :  { %v2162_v37 = vadd.f32 %v2688_v27, %v1983_v35 }
 0x303   :  { %v2170_v38 = vadd.f32 %v2511_v36, %v2162_v37 }
 0x305   :  { %v2171_v39 = vmax.f32 %v2170_v38, 0.0 }
 0x307   :  { %2711 = vmatmul.mubr.msk.f32.vlgmr.msra.gmra.mrb[2].mxu0 %vm2183_vm12, %v2171_v39 }
 0x3da   :  { %v2253_v44 = vpop.f32.mrb[2].mxu0 }
 0x3db   :  { %v2254_v45 = vadd.f32 %v2512_v43, %v2253_v44  ;;  %v2712_v46 = vpop.f32.mrb[3].mxu0 }
 0x3dd   :  { %v2257_v47 = vmax.f32 %v2254_v45, 0.0 }
 0x3df   :  { %2722 = vmatmul.mubr.msk.f32.vlgmr.msra.gmra.mrb[2].mxu1 %vm2183_vm12, %v2257_v47 }
 0x4b2   :  { %v2338_v50 = vpop.f32.mrb[2].mxu1 }
 0x4b3   :  { %v2339_v51 = vadd.f32 %v2514_v48, %v2338_v50  ;;  %v2723_v52 = vpop.f32.mrb[3].mxu1 }
 0x4b5   :  { %2344 = vperm.xlu0 %2802, %v2339_v51   ;;  %2348 = vrot.lane.b32.xlu1 %v2339_v51, %s2958_s0 }
 0x527   :  { %v2349_v49 = vpop.permute.xlu1 %2348 }
 0x528   :  { %v2352_v53 = vsel %vm2351_vm13, %v2349_v49, 0.0 }
 0x529   :  { %2353 = vadd.xlane.f32.xlu1 %v2352_v53 }
 0x534   :  { %v2345_v54 = vpop.permute.xlu0 %2344 }
 0x535   :  { %v2347_v56 = vadd.f32 %v2345_v54, %v2339_v51 }
 0x5b6   :  { %v2354_v55 = vpop.xlane.xlu1 %2353 }
 0x5b7   :  { %v2356_v57 = vmul.f32 0.16666667, %v2354_v55 }
 0x5b9   :  { %v2357_v58 = vsub.f32 %v2347_v56, %v2356_v57 }
 0x5bb   :  { %2359 = vrot.lane.b32.xlu0 %v2357_v58, %s2958_s0 }
 0x62d   :  { %v2360_v59 = vpop.permute.xlu0 %2359 }
 0x62e   :  { %2362 = vst.msk [vmem:[#allocation5] sm:$0x3] %vm2351_vm13, %v2360_v59 }
 0x62f   :  { %2943 = shalt.err (!%p2940_p4)
}
 0x630   :  { %s2944_s24 = scalar_lea.hbm %s3615_s9, 32 }
 0x631   :  { %p2945_p5 = scmp.ne.s32.totalorder %s3615_s9, %s2944_s24  ;;  %p2948_p6 = scmp.lt.u32.totalorder %s2944_s24, %s3615_s9 }
 0x633   :  { %p2950_p7 = pnand %p2948_p6, %p2945_p5 }
 0x635   :  { %2953 = shalt.err (!%p2950_p7)
}
 0x636   :  { %2372 = dma.vmem_to_hbm [thread:$0]  %s2370_s7, 32, %s3615_s9, [#allocation6]  }
 0x637   :  { %2954 = dma.done.wait [#allocation6], 32  }
 0x638   :  { %2955 = vsyncadd [#allocation6], 4294967264 }
 0x639   :  { %2376 = vsyncpa [#allocation6], 1 }

</bundles_post_ra>
